<compile_context>
chip_gen: v6e
topology: v6e:2x2x1
jax: 0.10.0
libtpu: 0.0.40
codegen_flags: <defaults>
</compile_context>

<pallas_src>
import functools

import jax
import jax.numpy as jnp
from jax import lax
from jax.experimental import pallas as pl
from jax.experimental.pallas import tpu as pltpu

_EPS = 1e-5


def _ln_kernel_packed(x_ref, w_ref, seg_ref, o_ref, *, inv_c):
    """Lane-dense path: each 128-lane row holds P = 128 // C original rows."""
    x = x_ref[...].astype(jnp.float32)                  # (rt, 128)
    seg = seg_ref[...]                                  # (128, 128) block-diag ones
    # Segmented sum + broadcast per C-lane segment, on the MXU (idle otherwise).
    s1 = jnp.dot(x, seg, preferred_element_type=jnp.float32,
                 precision=lax.Precision.HIGHEST)
    s2 = jnp.dot(x * x, seg, preferred_element_type=jnp.float32,
                 precision=lax.Precision.HIGHEST)
    mean = s1 * inv_c
    var = s2 * inv_c - mean * mean                      # unbiased=False variance
    inv = lax.rsqrt(var + _EPS)
    w = w_ref[...].astype(jnp.float32)                  # (1, 128) = weight tiled P times
    o_ref[...] = (x * inv * w).astype(o_ref.dtype)


def _ln_kernel_plain(x_ref, w_ref, o_ref, *, inv_c):
    """Fallback path: normalization axis is the full last block dim."""
    x = x_ref[...].astype(jnp.float32)                  # (rt, C)
    s1 = jnp.sum(x, axis=-1, keepdims=True)
    s2 = jnp.sum(x * x, axis=-1, keepdims=True)
    mean = s1 * inv_c
    var = s2 * inv_c - mean * mean
    inv = lax.rsqrt(var + _EPS)
    w = w_ref[...].astype(jnp.float32)                  # (1, C)
    o_ref[...] = (x * inv * w).astype(o_ref.dtype)


def _round_up(v, m):
    return ((v + m - 1) // m) * m


def biasfree_layernorm(x, weight, *, target_block_bytes=2 * 1024 * 1024):
    """x: (..., C); weight: (C,). BiasFree LayerNorm over the last dim."""
    orig_shape = x.shape
    C = orig_shape[-1]
    assert weight.shape == (C,)

    x2 = x.reshape(-1, C)
    N = x2.shape[0]
    itemsize = jnp.dtype(x.dtype).itemsize
    sub = 16 if itemsize == 2 else 8        # sublane granule (bf16 needs 16)

    # Lane-dense repack when the row-major bytes allow it (pure reshape).
    pack = 128 // C if (C < 128 and 128 % C == 0) else 1
    if pack > 1 and N % pack != 0:
        pack = 1

    if pack > 1:
        lane_c = 128
        n_rows = N // pack
        xk = x2.reshape(n_rows, lane_c)
        wk = jnp.tile(weight, pack).reshape(1, lane_c)
        lane = jnp.arange(lane_c, dtype=jnp.int32)
        seg = (lane[:, None] // C == lane[None, :] // C).astype(jnp.float32)
        kernel = functools.partial(_ln_kernel_packed, inv_c=1.0 / C)
        extra_inputs = (seg,)
        extra_specs = [pl.BlockSpec((lane_c, lane_c), lambda i: (0, 0))]
    else:
        lane_c = C
        n_rows = N
        xk = x2
        wk = weight.reshape(1, C)
        kernel = functools.partial(_ln_kernel_plain, inv_c=1.0 / C)
        extra_inputs = ()
        extra_specs = []

    # Row tile: ~target_block_bytes per block, multiple of the sublane granule,
    # but keep >= 2 grid steps when there are enough rows.
    rt = max(sub, (target_block_bytes // (lane_c * itemsize)) // sub * sub)
    rt = min(rt, _round_up(n_rows, sub))
    if n_rows > 2 * sub:
        rt = min(rt, max(sub, _round_up(pl.cdiv(n_rows, 2), sub)))
    grid = (pl.cdiv(n_rows, rt),)

    # VMEM: 2 buffers x (input + output) blocks + weight/seg + headroom.
    block_bytes = rt * lane_c * itemsize
    vmem_limit = int(min(max(6 * block_bytes + (4 << 20), 16 << 20), 48 << 20))

    out = pl.pallas_call(
        kernel,
        out_shape=jax.ShapeDtypeStruct((n_rows, lane_c), x.dtype),
        grid=grid,
        in_specs=[
            pl.BlockSpec((rt, lane_c), lambda i: (i, 0)),
            pl.BlockSpec((1, lane_c), lambda i: (0, 0)),
            *extra_specs,
        ],
        out_specs=pl.BlockSpec((rt, lane_c), lambda i: (i, 0)),
        compiler_params=pltpu.CompilerParams(
            dimension_semantics=("parallel",),
            vmem_limit_bytes=vmem_limit,
        ),
    )(xk, wk, *extra_inputs)

    return out.reshape(orig_shape)


def biasfree_layernorm_ref(x, weight):
    mu = jnp.mean(x, axis=-1, keepdims=True)
    var = jnp.mean((x - mu) ** 2, axis=-1, keepdims=True)
    return x / jnp.sqrt(var + 1e-5) * weight


if __name__ == "__main__":
    key = jax.random.PRNGKey(0)
    kx, kw = jax.random.split(key)

    B, H, W, C = 2, 16, 16, 32                 # normalized_shape = C = 32
    # (B, H*W, C): channels-last tokens, as fed to this LayerNorm in practice.
    x = jax.random.normal(kx, (B, H * W, C), dtype=jnp.float32)
    # Non-trivial weight to exercise the lane-tiled scale (module inits to ones).
    weight = 1.0 + 0.1 * jax.random.normal(kw, (C,), dtype=jnp.float32)

    out = jax.block_until_ready(biasfree_layernorm(x, weight))
    ref = biasfree_layernorm_ref(x, weight)

    assert out.shape == x.shape
    assert jnp.allclose(out, ref, atol=1e-5, rtol=1e-5), "mismatch vs reference"

    print("KERNEL_OK")
</pallas_src>

<mosaic_0001>
module attributes {stable_mosaic.version = 11 : i64} {
  func.func @_ln_kernel_packed(%arg0: i32, %arg1: memref<64x128xf32, #tpu.memory_space<vmem>>, %arg2: memref<1x128xf32, #tpu.memory_space<vmem>>, %arg3: memref<128x128xf32, #tpu.memory_space<vmem>>, %arg4: memref<64x128xf32, #tpu.memory_space<vmem>>) attributes {dimension_semantics = [#tpu.dimension_semantics<parallel>], iteration_bounds = array<i64: 2>, scalar_prefetch = 0 : i64, scratch_operands = 0 : i64, tpu.core_type = #tpu.core_type<tc>, window_params = [{transform_indices = @transform_0, window_bounds = array<i64: 64, 128>}, {pipeline_mode = #tpu.pipeline_mode<synchronous>, transform_indices = @transform_1, window_bounds = array<i64: 1, 128>}, {pipeline_mode = #tpu.pipeline_mode<synchronous>, transform_indices = @transform_2, window_bounds = array<i64: 128, 128>}, {transform_indices = @transform_3, window_bounds = array<i64: 64, 128>}]} {
    %c0 = arith.constant 0 : index
    %c0_0 = arith.constant 0 : index
    %0 = vector.load %arg1[%c0, %c0_0] : memref<64x128xf32, #tpu.memory_space<vmem>>, vector<64x128xf32>
    %c0_1 = arith.constant 0 : index
    %c0_2 = arith.constant 0 : index
    %1 = vector.load %arg3[%c0_1, %c0_2] : memref<128x128xf32, #tpu.memory_space<vmem>>, vector<128x128xf32>
    %cst = arith.constant dense<0.000000e+00> : vector<64x128xf32>
    %2 = tpu.matmul %0, %1, %cst {dimension_numbers = #tpu.dot_dimension_numbers<[1], [0], [0], [1], [0, 0, 1, 1], [], []>, precision = #tpu.contract_precision<fp32>} : vector<64x128xf32>, vector<128x128xf32>, vector<64x128xf32> -> vector<64x128xf32>
    %3 = arith.mulf %0, %0 : vector<64x128xf32>
    %cst_3 = arith.constant dense<0.000000e+00> : vector<64x128xf32>
    %4 = tpu.matmul %3, %1, %cst_3 {dimension_numbers = #tpu.dot_dimension_numbers<[1], [0], [0], [1], [0, 0, 1, 1], [], []>, precision = #tpu.contract_precision<fp32>} : vector<64x128xf32>, vector<128x128xf32>, vector<64x128xf32> -> vector<64x128xf32>
    %cst_4 = arith.constant 3.125000e-02 : f32
    %5 = vector.broadcast %cst_4 : f32 to vector<64x128xf32>
    %6 = arith.mulf %2, %5 : vector<64x128xf32>
    %cst_5 = arith.constant 3.125000e-02 : f32
    %7 = vector.broadcast %cst_5 : f32 to vector<64x128xf32>
    %8 = arith.mulf %4, %7 : vector<64x128xf32>
    %9 = arith.mulf %6, %6 : vector<64x128xf32>
    %10 = arith.subf %8, %9 : vector<64x128xf32>
    %cst_6 = arith.constant 9.99999974E-6 : f32
    %11 = vector.broadcast %cst_6 : f32 to vector<64x128xf32>
    %12 = arith.addf %10, %11 : vector<64x128xf32>
    %13 = math.rsqrt %12 : vector<64x128xf32>
    %c0_7 = arith.constant 0 : index
    %c0_8 = arith.constant 0 : index
    %14 = vector.load %arg2[%c0_7, %c0_8] : memref<1x128xf32, #tpu.memory_space<vmem>>, vector<1x128xf32>
    %15 = arith.mulf %0, %13 : vector<64x128xf32>
    %16 = vector.broadcast %14 : vector<1x128xf32> to vector<64x128xf32>
    %17 = arith.mulf %15, %16 : vector<64x128xf32>
    %c0_9 = arith.constant 0 : index
    %c0_10 = arith.constant 0 : index
    %18 = vector.load %arg4[%c0_9, %c0_10] : memref<64x128xf32, #tpu.memory_space<vmem>>, vector<64x128xf32>
    tpu.vector_store %arg4[%c0_9, %c0_10], %17 {strides = array<i32>} : memref<64x128xf32, #tpu.memory_space<vmem>>, vector<64x128xf32>,
    return
  }
  func.func @transform_0(%arg0: i32) -> (i32, i32) {
    %c0_i32 = arith.constant 0 : i32
    %c0_i32_0 = arith.constant 0 : i32
    return %arg0, %c0_i32 : i32, i32
  }
  func.func @transform_1(%arg0: i32) -> (i32, i32) {
    %c0_i32 = arith.constant 0 : i32
    %c0_i32_0 = arith.constant 0 : i32
    %c0_i32_1 = arith.constant 0 : i32
    return %c0_i32, %c0_i32_0 : i32, i32
  }
  func.func @transform_2(%arg0: i32) -> (i32, i32) {
    %c0_i32 = arith.constant 0 : i32
    %c0_i32_0 = arith.constant 0 : i32
    %c0_i32_1 = arith.constant 0 : i32
    return %c0_i32, %c0_i32_0 : i32, i32
  }
  func.func @transform_3(%arg0: i32) -> (i32, i32) {
    %c0_i32 = arith.constant 0 : i32
    %c0_i32_0 = arith.constant 0 : i32
    return %arg0, %c0_i32 : i32, i32
  }
}

</mosaic_0001>

<bundles_post_ra>
// kernel: tpu_custom_call.1
= control target key start
LH: loop header
LB: loop body
LE: loop exit
PB: predicated region body
PF: predicated region fallthrough
CT: control target
= control target key end

     0   :  { %8 = vsyncpa [#allocation3], 0  ;;  %s4578_s0 = inlined_call_operand.hbm [shape: f32[128,128], index: 0, kind: input, shape index: {}]   ;;  %s4579_s1 = inlined_call_operand.vmem [shape: f32[1,128], index: 1, kind: input, shape index: {}]   ;;  %s4580_s2 = inlined_call_operand.hbm [shape: f32[128,128], index: 2, kind: input, shape index: {}]   ;;  %s4581_s3 = inlined_call_operand.hbm [shape: f32[128,128], index: 3, kind: output, shape index: {}]  }
   0x1   :  { %10 = vsyncpa [#allocation3 + $0x1], 0 }
   0x2   :  { %11 = vsyncpa [#allocation6], 0 }
   0x3   :  { %12 = vsyncpa [#allocation4], 0 }
   0x4   :  { %14 = vsyncpa [#allocation4 + $0x1], 0  ;;  %s3369_s12 = smov 0   ;;  %s3371_s13 = smov 0  }
   0x5   :  { %s3373_s14 = smov 0   ;;  %s3375_s15 = smov 0  }
   0x6 LB: > { %s3390_s16 = sadd.s32 4294967295, %s3340_s15   ;;  %s2298_s17 = sadd.s32 4294967294, %s3340_s15   ;;  %s3340_s15 = sphi %s3375_s15, %s4786_s15   ;;  %s3336_s14 = sphi %s3373_s14, %s4785_s14   ;;  %s3332_s13 = sphi %s3371_s13, %s4784_s13   ;;  %s3328_s12 = sphi %s3369_s12, %s4783_s12  }
   0x7   : > { %p40_p0 = scmp.ne.s32.totalorder %s3332_s13, %s3328_s12  ;;  %p4582_p1 = scmp.eq.s32.totalorder %s3390_s16, 0 }
   0x8   : > { %p112_p3 = scmp.eq.s32.totalorder %s2298_s17, 1  ;;  %p2299_p5 = scmp.ge.s32.totalorder %s3340_s15, 1 }
   0x9   : > { %p3399_p4 = por %p4582_p1, %p40_p0  ;;  %p119_p7 = scmp.lt.s32.totalorder %s3340_s15, 3 }
   0xa   : > { %p3404_p6 = por %p112_p3, %p40_p0  ;;  %s3342_s21 = smov [#allocation5]  }
   0xb   : > { %s4649_s18 = scalar_select %p3399_p4, 1, 0 }
   0xc   : > { %s4650_s19 = scalar_select %p3404_p6, 1, 0 }
   0xd   : > { %p3409_p8 = pnand %p2299_p5, %p119_p7  ;;  %s134_s22 = sshll.u32 %s3342_s21, 4  ;;  %s135_s22 = int_to_ptr.vmem [resolvable:$true] %s134_s22 }
   0xe   : > { %s3423_s24 = sadd.s32 1, %s3340_s15   ;;  %s27_s25 = sadd.s32 1, %s3336_s14 }
   0xf   : > { %s4651_s20 = scalar_select %p3409_p8, 1, 0 }
  0x10   : > { %p3141_p9 = pneg %p3409_p8  ;;  %s24_s26 = ssub.s32 %s3340_s15, %s3423_s24 }
  0x11   : > { %s3229_s27 = scalar_lea.vmem %s135_s22, 2048  ;;  %p3237_p5 = scmp.lt.s32.totalorder %s135_s22, %s135_s22 }
  0x12   : > { %p3418_p11 = pnand %p3141_p9, %p4582_p1  ;;  %p3230_p13 = scmp.ne.s32.totalorder %s135_s22, %s3229_s27 }
  0x13   : > { %p3238_p7 = scmp.lt.s32.totalorder %s3229_s27, %s3229_s27 }
  0x14   : > { %p3220_p12 = pneg %p3418_p11 }
  0x15   : > { %p3239_p10 = por %p3238_p7, %p3237_p5 }
  0x16   : > { %p3232_p0 = pnand %p3230_p13, %p3220_p12 }
  0x18   : > { %p3233_p3 = pneg %p3232_p0 }
  0x1a   : > { %p3240_p2 = pnand %p3239_p10, %p3233_p3 }
  0x1c   : > { %3243 = shalt.err (!%p3240_p2)
}
  0x1d   : > { %s3343_s28 = smov 128   ;;  %s3344_s29 = smov 8  }
  0x1e   : > { %3144 = dma.hbm_to_vmem [thread:$0]  (!%p3418_p11), %s4580_s2, 2048, %s135_s22, [#allocation6], %s3343_s28, %s3343_s28, %s3344_s29  }
  0x1f   : > { %p25_p2 = scmp.eq.s32.totalorder %s24_s26, 0  ;;  %p34_p9 = scmp.ne.s32.totalorder %s3336_s14, %s3332_s13 }
  0x20   : > { %p35_p10 = scmp.eq.s32.totalorder %s3340_s15, 0  ;;  %p3154_p12 = scmp.lt.s32.totalorder %s3340_s15, 2 }
  0x21   : > { %s3443_s5 = scalar_select %p25_p2, %s3336_s14, %s27_s25  }
  0x22   : > { %p36_p13 = por %p35_p10, %p34_p9  ;;  %p4653_p0 = scmp.eq.s32.totalorder %s3390_s16, 1 }
  0x23   : > { %s148_s7 = sand.u32 1, %s3336_s14   ;;  %s2315_s8 = sshll.u32 %s3340_s15, 10 }
  0x24   : > { %p3447_p3 = por %p4653_p0, %p34_p9  ;;  %s2302_s9 = sshll.u32 %s148_s7, 6 }
  0x25   : > { %s3456_s17 = scalar_lea.hbm %s4578_s0, %s2315_s8  ;;  %s152_s21 = scalar_lea.vmem [#allocation2], %s2302_s9 }
  0x26   : > { %s4654_s6 = scalar_select %p3447_p3, 1, 0 }
  0x27   : > { %s159_s22 = sshll.u32 %s152_s21, 4  ;;  %p3458_p11 = pnand %p3154_p12, %p36_p13  ;;  %s3462_s22 = int_to_ptr.vmem [resolvable:$true] %s159_s22 }
  0x28   : > { %s3464_s25 = scalar_lea.sflag [#allocation3], %s148_s7  ;;  %s3244_s26 = scalar_lea.hbm %s3456_s17, 1024 }
  0x29   : > { %p3245_p5 = scmp.ne.s32.totalorder %s3456_s17, %s3244_s26  ;;  %p3246_p7 = pneg %p3458_p11 }
  0x2a   : > { %s3249_s4 = scalar_lea.hbm %s4578_s0, 2048  ;;  %p3250_p10 = scmp.lt.s32.totalorder %s3456_s17, %s4578_s0 }
  0x2b   : > { %p3247_p2 = pnand %p3246_p7, %p3245_p5  ;;  %p3251_p12 = scmp.lt.s32.totalorder %s3249_s4, %s3244_s26 }
  0x2d   : > { %p3248_p9 = pneg %p3247_p2  ;;  %p3252_p13 = por %p3251_p12, %p3250_p10 }
  0x2f   : > { %p3253_p0 = pnand %p3252_p13, %p3248_p9 }
  0x31   : > { %3256 = shalt.err (!%p3253_p0)
}
  0x32   : > { %s3257_s7 = scalar_lea.vmem %s3462_s22, 1024  ;;  %s3345_s10 = smov [#allocation2]  }
  0x33   : > { %p3258_p1 = scmp.ne.s32.totalorder %s3462_s22, %s3257_s7  ;;  %s3262_s11 = sshll.u32 %s3345_s10, 4  ;;  %s3263_s11 = int_to_ptr.vmem [resolvable:$false] %s3262_s11 }
  0x34   : > { %s3264_s21 = scalar_lea.vmem %s3263_s11, 2048  ;;  %p3265_p2 = scmp.lt.s32.totalorder %s3462_s22, %s3263_s11 }
  0x35   : > { %p3260_p6 = pnand %p3258_p1, %p3246_p7  ;;  %p3266_p3 = scmp.lt.s32.totalorder %s3264_s21, %s3257_s7 }
  0x37   : > { %p3261_p5 = pneg %p3260_p6  ;;  %p3267_p4 = por %p3266_p3, %p3265_p2 }
  0x39   : > { %p3268_p8 = pnand %p3267_p4, %p3261_p5 }
  0x3b   : > { %3271 = shalt.err (!%p3268_p8)
}
  0x3c   : > { %3148 = dma.hbm_to_vmem [thread:$0]  (!%p3458_p11), %s3456_s17, 1024, %s3462_s22, %s3464_s25, %s3343_s28, %s3343_s28, %s3344_s29  }
  0x3d   : > { %p4656_p1 = scmp.ne.s32.totalorder %s4651_s20, 0 }
  0x3f   : > { %171 = sbr.rel (%p4656_p1) target bundleno = 566 (0x236), region = 32 }
  0x44   : > { %s3491_s26 = sand.u32 1, %s3332_s13   ;;  %p4657_p4 = scmp.ne.s32.totalorder %s4649_s18, 0 }
  0x45   : > { %s2306_s27 = sshll.u32 %s3491_s26, 6  ;;  %s174_s30 = scalar_lea.sflag [#allocation3], %s3491_s26 }
  0x46   : > { %s3497_s23 = scalar_lea.vmem [#allocation2], %s2306_s27 }
  0x47   : > { %3315 = dma.done.wait (%p4657_p4), %s174_s30, 1024  }
  0x48   : > { %3317 = vsyncadd (%p4657_p4), %s174_s30, 4294966272  ;;  %p4658_p6 = scmp.eq.s32.totalorder %s3390_s16, 0 }
  0x4a   : > { %3319 = dma.done.wait (%p4658_p6), [#allocation6], 2048   ;;  %p4659_p8 = pmov %p4658_p6 }
  0x4b   : > { %v229_v0 = vld [vmem:[#allocation5 + $0x78] sm:$0xff]  ;;  %v228_v1 = vld [vmem:[#allocation5 + $0x70] sm:$0xff]  ;;  %v227_v2 = vld [vmem:[#allocation5 + $0x68] sm:$0xff]  ;;  %s4512_s28 = scalar_lea.vmem [#allocation7], %s2306_s27  ;;  %s2316_s29 = sshll.u32 %s3390_s16, 10 }
  0x4c   : > { %3321 = vsyncadd (%p4659_p8), [#allocation6], 4294965248  ;;  %v3507_v3 = vand.u32 4294901760, %v229_v0  ;;  %v3509_v4 = vand.u32 4294901760, %v228_v1  ;;  %v3511_v5 = vand.u32 4294901760, %v227_v2  ;;  %v226_v6 = vld [vmem:[#allocation5 + $0x60] sm:$0xff]  ;;  %s4531_s4 = scalar_lea.hbm %s4581_s3, %s2316_s29 }
  0x4d   : > { %v225_v7 = vld [vmem:[#allocation5 + $0x58] sm:$0xff]  ;;  %v224_v8 = vld [vmem:[#allocation5 + $0x50] sm:$0xff]  ;;  %v3513_v9 = vand.u32 4294901760, %v226_v6  ;;  %v223_v12 = vld [vmem:[#allocation5 + $0x48] sm:$0xff]  ;;  %s2215_s17 = sshll.u32 %s4512_s28, 4  ;;  %s2202_s16 = scalar_lea.sflag [#allocation4], %s3491_s26  ;;  %s4533_s17 = int_to_ptr.vmem [resolvable:$true] %s2215_s17 }
  0x4e   : > { %v3515_v10 = vand.u32 4294901760, %v225_v7  ;;  %v3517_v11 = vand.u32 4294901760, %v224_v8  ;;  %v222_v13 = vld [vmem:[#allocation5 + $0x40] sm:$0xff]  ;;  %2605 = vmatprep.subr.mxu0 %v3507_v3  ;;  %v3521_v14 = vsub.f32 %v229_v0, %v3507_v3  ;;  %v3524_v15 = vsub.f32 %v228_v1, %v3509_v4  ;;  %v221_v18 = vld [vmem:[#allocation5 + $0x38] sm:$0xff]  ;;  %v220_v25 = vld [vmem:[#allocation5 + $0x30] sm:$0xff]  ;;  %s3272_s8 = scalar_lea.vmem %s4533_s17, 1024 }
  0x4f   : > { %v3526_v16 = vand.u32 4294901760, %v223_v12  ;;  %v3529_v17 = vsub.f32 %v227_v2, %v3511_v5  ;;  %2606 = vmatpush3.msra.mxu0 %v3507_v3  ;;  %v3533_v19 = vsub.f32 %v226_v6, %v3513_v9  ;;  %v3548_v24 = vand.u32 4294901760, %v222_v13  ;;  %v219_v35 = vld [vmem:[#allocation5 + $0x28] sm:$0xff]  ;;  %v218_v40 = vld [vmem:[#allocation5 + $0x20] sm:$0xff]  ;;  %v217_v48 = vld [vmem:[#allocation5 + $0x18] sm:$0xff]  ;;  %p3273_p3 = scmp.ne.s32.totalorder %s4533_s17, %s3272_s8  ;;  %p4780_p11 = scmp.ne.s32.totalorder %s4654_s6, 0 }
  0x50   : > { %4660 = vst [vmem:[#allocation11_spill] sm:$0xff] %v3521_v14  ;;  %4661 = vst [vmem:[#allocation12_spill] sm:$0xff] %v3524_v15  ;;  %v3536_v20 = vsub.f32 %v225_v7, %v3515_v10  ;;  %2607 = vmatprep.subr.mxu0 %v3509_v4  ;;  %v3540_v21 = vand.u32 4294901760, %v3521_v14  ;;  %v3543_v22 = vand.u32 4294901760, %v3524_v15  ;;  %v3554_v27 = vand.u32 4294901760, %v221_v18  ;;  %v3608_v49 = vld [vmem:[%s3497_s23] sm:$0xff] }
  0x51   : > { %4662 = vst [vmem:[#allocation13_spill] sm:$0xff] %v3529_v17  ;;  %4663 = vst [vmem:[#allocation14_spill] sm:$0xff] %v3533_v19  ;;  %v3546_v23 = vand.u32 4294901760, %v3529_v17  ;;  %2608 = vmatpush3.msra.mxu0 %v3509_v4  ;;  %v3552_v26 = vand.u32 4294901760, %v3533_v19  ;;  %v3560_v29 = vsub.f32 %v224_v8, %v3517_v11  ;;  %v3570_v33 = vsub.f32 %v223_v12, %v3526_v16  ;;  %v3623_v54 = vld [vmem:[%s3497_s23 + $0x8] sm:$0xff]  ;;  %v216_v59 = vld [vmem:[#allocation5 + $0x10] sm:$0xff]  ;;  %p3274_p7 = pnand %p3273_p3, %p4780_p11 }
  0x52   : > { %4664 = vst [vmem:[#allocation15_spill] sm:$0xff] %v3536_v20  ;;  %v3557_v28 = vand.u32 4294901760, %v3536_v20  ;;  %2609 = vmatprep.subr.mxu0 %v3511_v5  ;;  %v395_v30 = vsub.f32 %v3521_v14, %v3540_v21  ;;  %v402_v31 = vsub.f32 %v3524_v15, %v3543_v22  ;;  %v3573_v34 = vand.u32 4294901760, %v220_v25  ;;  %4671 = vst [vmem:[#allocation22_spill] sm:$0xff] %v3608_v49  ;;  %v215_v2 = vld [vmem:[#allocation5 + $0x8] sm:$0xff]  ;;  %s3346_s9 = smov [#allocation7]  }
  0x53   : > { %4665 = vst [vmem:[#allocation16_spill] sm:$0xff] %v3560_v29  ;;  %v409_v32 = vsub.f32 %v3529_v17, %v3546_v23  ;;  %4666 = vst [vmem:[#allocation17_spill] sm:$0xff] %v3570_v33  ;;  %2610 = vmatpush3.msra.mxu0 %v3511_v5  ;;  %v416_v38 = vsub.f32 %v3533_v19, %v3552_v26  ;;  %v3583_v39 = vand.u32 4294901760, %v3560_v29  ;;  %v3589_v42 = vand.u32 4294901760, %v3570_v33  ;;  %p3275_p9 = pneg %p3274_p7  ;;  %s3276_s7 = sshll.u32 %s3346_s9, 4  ;;  %s3277_s7 = int_to_ptr.vmem [resolvable:$false] %s3276_s7 }
  0x54   : > { %2611 = vmatprep.subr.mxu0 %v3513_v9  ;;  %v3576_v36 = vand.u32 4294901760, %v395_v30  ;;  %v3578_v37 = vand.u32 4294901760, %v402_v31  ;;  %v423_v41 = vsub.f32 %v3536_v20, %v3557_v28  ;;  %v3592_v43 = vsub.f32 %v222_v13, %v3548_v24  ;;  %4673 = vst [vmem:[#allocation24_spill] sm:$0xff] %v3623_v54  ;;  %s3278_s10 = scalar_lea.vmem %s3277_s7, 2048  ;;  %p3279_p10 = scmp.lt.s32.totalorder %s4533_s17, %s3277_s7 }
  0x55   : > { %2612 = vmatpush3.msra.mxu0 %v3513_v9  ;;  %v3596_v44 = vand.u32 4294901760, %v409_v32  ;;  %v3598_v45 = vand.u32 4294901760, %v219_v35  ;;  %v3601_v46 = vsub.f32 %v221_v18, %v3554_v27  ;;  %v3605_v47 = vand.u32 4294901760, %v218_v40  ;;  %v214_v18 = vld [vmem:[#allocation5] sm:$0xff]  ;;  %p3280_p12 = scmp.lt.s32.totalorder %s3278_s10, %s3272_s8 }
  0x56   : > { %4667 = vst [vmem:[#allocation18_spill] sm:$0xff] %v3576_v36  ;;  %4668 = vst [vmem:[#allocation19_spill] sm:$0xff] %v3578_v37  ;;  %2613 = vmatprep.subr.mxu0 %v3515_v10  ;;  %2649 = vmatprep.subr.mxu1 %v3576_v36  ;;  %v3612_v50 = vand.u32 4294901760, %v416_v38  ;;  %v430_v51 = vsub.f32 %v3560_v29, %v3583_v39  ;;  %v3617_v52 = vand.u32 4294901760, %v3592_v43  ;;  %v3627_v55 = vand.u32 4294901760, %v423_v41 }
  0x57   : > { %4669 = vst [vmem:[#allocation20_spill] sm:$0xff] %v3592_v43  ;;  %4670 = vst [vmem:[#allocation21_spill] sm:$0xff] %v3596_v44  ;;  %2614 = vmatpush3.msra.mxu0 %v3515_v10  ;;  %2650 = vmatpush3.msra.mxu1 %v3576_v36  ;;  %v3620_v53 = vsub.f32 %v220_v25, %v3573_v34  ;;  %v437_v56 = vsub.f32 %v3570_v33, %v3589_v42  ;;  %v3633_v57 = vand.u32 4294901760, %v217_v48  ;;  %p3281_p13 = por %p3280_p12, %p3279_p10 }
  0x58   : > { %2615 = vmatprep.subr.mxu0 %v3517_v11  ;;  %2651 = vmatprep.subr.mxu1 %v3578_v37  ;;  %4672 = vst [vmem:[#allocation23_spill] sm:$0xff] %v3612_v50  ;;  %4674 = vst [vmem:[#allocation25_spill] sm:$0xff] %v3627_v55  ;;  %v3636_v58 = vand.u32 4294901760, %v3601_v46  ;;  %v3639_v60 = vsub.f32 %v219_v35, %v3598_v45  ;;  %v3642_v61 = vand.u32 4294901760, %v3608_v49  ;;  %v3647_v62 = vand.u32 4294901760, %v3623_v54 }
  0x59   : > { %2616 = vmatpush3.msra.mxu0 %v3517_v11  ;;  %2652 = vmatpush3.msra.mxu1 %v3578_v37  ;;  %v3651_v63 = vand.u32 4294901760, %v430_v51  ;;  %v444_v0 = vsub.f32 %v3592_v43, %v3617_v52  ;;  %v3656_v1 = vand.u32 4294901760, %v3620_v53  ;;  %v3659_v6 = vsub.f32 %v218_v40, %v3605_v47  ;;  %v3774_v37 = vld [vmem:[%s3497_s23 + $0x10] sm:$0xff]  ;;  %p3282_p0 = pnand %p3281_p13, %p3275_p9 }
  0x5a   : > { %2617 = vmatprep.subr.mxu0 %v3526_v16  ;;  %2653 = vmatprep.subr.mxu1 %v3596_v44  ;;  %4675 = vst [vmem:[#allocation26_spill] sm:$0xff] %v3647_v62  ;;  %v3663_v7 = vand.u32 4294901760, %v437_v56  ;;  %v3665_v8 = vand.u32 4294901760, %v216_v59  ;;  %v451_v12 = vsub.f32 %v3601_v46, %v3636_v58  ;;  %v3672_v13 = vand.u32 4294901760, %v3639_v60  ;;  %4686 = vst [vmem:[#allocation35_spill] sm:$0xff] %v3774_v37 }
  0x5b   : > { %2618 = vmatpush3.msra.mxu0 %v3526_v16  ;;  %2654 = vmatpush3.msra.mxu1 %v3596_v44  ;;  %4676 = vst [vmem:[#allocation27_spill] sm:$0xff] %v3651_v63  ;;  %v3676_v25 = vsub.f32 %v3608_v49, %v3642_v61  ;;  %v3679_v30 = vsub.f32 %v217_v48, %v3633_v57  ;;  %v3683_v31 = vand.u32 4294901760, %v215_v2  ;;  %v3691_v35 = vand.u32 4294901760, %v444_v0 }
  0x5c   : > { %2619 = vmatprep.subr.mxu0 %v3548_v24  ;;  %2655 = vmatprep.subr.mxu1 %v3612_v50  ;;  %4677 = vst [vmem:[#allocation28_spill] sm:$0xff] %v3663_v7  ;;  %v3687_v32 = vsub.f32 %v3623_v54, %v3647_v62  ;;  %v458_v38 = vsub.f32 %v3620_v53, %v3656_v1  ;;  %v3696_v40 = vand.u32 4294901760, %v3659_v6  ;;  %v3700_v41 = vand.u32 4294901760, %v214_v18 }
  0x5d   : > { %2620 = vmatpush3.msra.mxu0 %v3548_v24  ;;  %2656 = vmatpush3.msra.mxu1 %v3612_v50  ;;  %4678 = vst [vmem:[#allocation29_spill] sm:$0xff] %v3691_v35  ;;  %v3703_v48 = vsub.f32 %v216_v59, %v3665_v8  ;;  %v3707_v51 = vand.u32 4294901760, %v451_v12  ;;  %v465_v56 = vsub.f32 %v3639_v60, %v3672_v13  ;;  %v3790_v36 = vand.u32 4294901760, %v3774_v37 }
  0x5e   : > { %2621 = vmatprep.subr.mxu0 %v3554_v27  ;;  %2657 = vmatprep.subr.mxu1 %v3627_v55  ;;  %v3723_v12 = vand.u32 4294901760, %v458_v38  ;;  %v472_v0 = vsub.f32 %v3659_v6, %v3696_v40  ;;  %v3733_v59 = vsub.f32 %v214_v18, %v3700_v41  ;;  %v4682_v38 = vand.u32 4294901760, %v3676_v25 }
  0x5f   : > { %2622 = vmatpush3.msra.mxu0 %v3554_v27  ;;  %2658 = vmatpush3.msra.mxu1 %v3627_v55  ;;  %4679 = vst [vmem:[#allocation30_spill] sm:$0xff] %v3707_v51  ;;  %v3713_v55 = vand.u32 4294901760, %v3679_v30  ;;  %v4683_v18 = vand.u32 4294901760, %v3687_v32 }
  0x60   : > { %2623 = vmatprep.subr.mxu0 %v3573_v34  ;;  %2659 = vmatprep.subr.mxu1 %v3651_v63  ;;  %4680 = vst [vmem:[#allocation31_spill] sm:$0xff] %v3723_v12  ;;  %v314_v50 = vsub.f32 %v3676_v25, %v4682_v38 }
  0x61   : > { %2624 = vmatpush3.msra.mxu0 %v3573_v34  ;;  %2660 = vmatpush3.msra.mxu1 %v3651_v63  ;;  %v3719_v63 = vsub.f32 %v215_v2, %v3683_v31  ;;  %v3737_v2 = vand.u32 4294901760, %v465_v56  ;;  %v479_v44 = vsub.f32 %v3679_v30, %v3713_v55  ;;  %v3754_v56 = vand.u32 4294901760, %v472_v0 }
  0x62   : > { %2625 = vmatprep.subr.mxu0 %v3598_v45  ;;  %2661 = vmatprep.subr.mxu1 %v3663_v7 }
  0x63   : > { %2626 = vmatpush3.msra.mxu0 %v3598_v45  ;;  %2662 = vmatpush3.msra.mxu1 %v3663_v7  ;;  %v3730_v7 = vand.u32 4294901760, %v3703_v48  ;;  %4681 = vst [vmem:[#allocation32_spill] sm:$0xff] %v3737_v2  ;;  %v3750_v54 = vand.u32 4294901760, %v3719_v63  ;;  %4684 = vst [vmem:[#allocation33_spill] sm:$0xff] %v3754_v56  ;;  %v3765_v49 = vand.u32 4294901760, %v479_v44 }
  0x64   : > { %2627 = vmatprep.subr.mxu0 %v3605_v47  ;;  %2663 = vmatprep.subr.mxu1 %v3691_v35 }
  0x65   : > { %2628 = vmatpush3.msra.mxu0 %v3605_v47  ;;  %2664 = vmatpush3.msra.mxu1 %v3691_v35  ;;  %v324_v35 = vsub.f32 %v3687_v32, %v4683_v18  ;;  %v486_v38 = vsub.f32 %v3703_v48, %v3730_v7  ;;  %v315_v18 = vand.u32 4294901760, %v314_v50  ;;  %4685 = vst [vmem:[#allocation34_spill] sm:$0xff] %v3765_v49 }
  0x66   : > { %2629 = vmatprep.subr.mxu0 %v3633_v57  ;;  %2665 = vmatprep.subr.mxu1 %v3707_v51 }
  0x67   : > { %2630 = vmatpush3.msra.mxu0 %v3633_v57  ;;  %2666 = vmatpush3.msra.mxu1 %v3707_v51  ;;  %v3761_v51 = vand.u32 4294901760, %v3733_v59  ;;  %v325_v0 = vand.u32 4294901760, %v324_v35  ;;  %v3778_v44 = vand.u32 4294901760, %v486_v38  ;;  %v3783_v35 = vld [vmem:[%s3497_s23 + $0x18] sm:$0xff] }
  0x68   : > { %2631 = vmatprep.subr.mxu0 %v3665_v8  ;;  %2667 = vmatprep.subr.mxu1 %v3723_v12  ;;  %4688 = vst [vmem:[#allocation37_spill] sm:$0xff] %v3783_v35  ;;  %v3795_v38 = vand.u32 4294901760, %v3783_v35 }
  0x69   : > { %2632 = vmatpush3.msra.mxu0 %v3665_v8  ;;  %2668 = vmatpush3.msra.mxu1 %v3723_v12  ;;  %v493_v12 = vsub.f32 %v3719_v63, %v3750_v54  ;;  %4687 = vst [vmem:[#allocation36_spill] sm:$0xff] %v3778_v44  ;;  %v500_v50 = vsub.f32 %v3733_v59, %v3761_v51 }
  0x6a   : > { %2633 = vmatprep.subr.mxu0 %v3683_v31  ;;  %2669 = vmatprep.subr.mxu1 %v3737_v2 }
  0x6b   : > { %2634 = vmatpush3.msra.mxu0 %v3683_v31  ;;  %2670 = vmatpush3.msra.mxu1 %v3737_v2  ;;  %v3787_v2 = vand.u32 4294901760, %v493_v12  ;;  %v3807_v12 = vld [vmem:[%s3497_s23 + $0x28] sm:$0xff] }
  0x6c   : > { %2635 = vmatprep.subr.mxu0 %v3700_v41  ;;  %2671 = vmatprep.subr.mxu1 %v3754_v56  ;;  %4692 = vst [vmem:[#allocation41_spill] sm:$0xff] %v3807_v12 }
  0x6d   : > { %2636 = vmatpush3.msra.mxu0 %v3700_v41  ;;  %2672 = vmatpush3.msra.mxu1 %v3754_v56  ;;  %4689 = vst [vmem:[#allocation38_spill] sm:$0xff] %v3787_v2  ;;  %v3802_v56 = vld [vmem:[%s3497_s23 + $0x20] sm:$0xff] }
  0x6e   : > { %2637 = vmatprep.mubr.f32.mxu0 %v315_v18  ;;  %2673 = vmatprep.subr.mxu1 %v3765_v49  ;;  %v3799_v18 = vand.u32 4294901760, %v500_v50  ;;  %4691 = vst [vmem:[#allocation40_spill] sm:$0xff] %v3802_v56  ;;  %v3819_v50 = vsub.f32 %v3783_v35, %v3795_v38 }
  0x6f   : > { %2693 = vmatprep.subr.mxu0 %v3521_v14  ;;  %2638 = vmatmul.mubr.f32.vlgmr.msra.gmra.mxu0 %v325_v0  ;;  %v3813_v0 = vsub.f32 %v3774_v37, %v3790_v36 }
  0x70   : > { %2674 = vmatpush3.msra.mxu1 %v3765_v49  ;;  %2694 = vmatpush3.msra.mxu0 %v3521_v14  ;;  %4690 = vst [vmem:[#allocation39_spill] sm:$0xff] %v3799_v18 }
  0x71   : > { %2675 = vmatprep.subr.mxu1 %v3778_v44  ;;  %2695 = vmatprep.subr.mxu0 %v3524_v15 }
  0x72   : > { %2676 = vmatpush3.msra.mxu1 %v3778_v44  ;;  %2696 = vmatpush3.msra.mxu0 %v3524_v15  ;;  %v3822_v15 = vand.u32 4294901760, %v3802_v56  ;;  %v3827_v44 = vand.u32 4294901760, %v3807_v12 }
  0x73   : > { %2677 = vmatprep.subr.mxu1 %v3787_v2  ;;  %2697 = vmatprep.subr.mxu0 %v3529_v17 }
  0x74   : > { %2678 = vmatpush3.msra.mxu1 %v3787_v2  ;;  %2698 = vmatpush3.msra.mxu0 %v3529_v17  ;;  %v3835_v2 = vld [vmem:[%s3497_s23 + $0x30] sm:$0xff]  ;;  %v3842_v49 = vsub.f32 %v3802_v56, %v3822_v15  ;;  %v3851_v17 = vsub.f32 %v3807_v12, %v3827_v44  ;;  %v4695_v12 = vand.u32 4294901760, %v3819_v50 }
  0x75   : > { %2679 = vmatprep.subr.mxu1 %v3799_v18  ;;  %2699 = vmatprep.subr.mxu0 %v3533_v19  ;;  %v3856_v14 = vand.u32 4294901760, %v3835_v2 }
  0x76   : > { %2680 = vmatpush3.msra.mxu1 %v3799_v18  ;;  %2681 = vmatprep.mubr.f32.mxu1 %v3642_v61  ;;  %v3845_v18 = vld [vmem:[%s3497_s23 + $0x38] sm:$0xff]  ;;  %v344_v35 = vsub.f32 %v3819_v50, %v4695_v12 }
  0x77   : > { %2700 = vmatpush3.msra.mxu0 %v3533_v19  ;;  %2682 = vmatmul.mubr.f32.vlgmr.msra.gmra.mxu1 %v3647_v62  ;;  %4693 = vst [vmem:[#allocation42_spill] sm:$0xff] %v3845_v18  ;;  %v4694_v19 = vand.u32 4294901760, %v3813_v0  ;;  %v3864_v56 = vand.u32 4294901760, %v3845_v18 }
  0x78   : > { %2701 = vmatprep.subr.mxu0 %v3536_v20  ;;  %2737 = vmatprep.subr.mxu1 %v3507_v3 }
  0x79   : > { %2702 = vmatpush3.msra.mxu0 %v3536_v20  ;;  %2738 = vmatpush3.msra.mxu1 %v3507_v3  ;;  %v334_v20 = vsub.f32 %v3813_v0, %v4694_v19  ;;  %v3879_v19 = vsub.f32 %v3835_v2, %v3856_v14  ;;  %v3885_v37 = vsub.f32 %v3845_v18, %v3864_v56 }
  0x7a   : > { %2703 = vmatprep.subr.mxu0 %v3560_v29  ;;  %2739 = vmatprep.subr.mxu1 %v3509_v4 }
  0x7b   : > { %2704 = vmatpush3.msra.mxu0 %v3560_v29  ;;  %2740 = vmatpush3.msra.mxu1 %v3509_v4  ;;  %v335_v12 = vand.u32 4294901760, %v334_v20  ;;  %v345_v29 = vand.u32 4294901760, %v344_v35  ;;  %v373_v18 = vand.u32 4294901760, %v3879_v19  ;;  %v383_v35 = vand.u32 4294901760, %v3885_v37 }
  0x7c   : > { %2705 = vmatprep.subr.mxu0 %v3570_v33  ;;  %2741 = vmatprep.subr.mxu1 %v3511_v5 }
  0x7d   : > { %2706 = vmatpush3.msra.mxu0 %v3570_v33  ;;  %2742 = vmatpush3.msra.mxu1 %v3511_v5  ;;  %v4696_v33 = vand.u32 4294901760, %v3842_v49 }
  0x7e   : > { %2707 = vmatprep.subr.mxu0 %v3592_v43  ;;  %2743 = vmatprep.subr.mxu1 %v3513_v9 }
  0x7f   : > { %2708 = vmatpush3.msra.mxu0 %v3592_v43  ;;  %2744 = vmatpush3.msra.mxu1 %v3513_v9  ;;  %v354_v62 = vsub.f32 %v3842_v49, %v4696_v33  ;;  %v4697_v43 = vand.u32 4294901760, %v3851_v17 }
  0x80   : > { %2709 = vmatprep.subr.mxu0 %v3601_v46  ;;  %2745 = vmatprep.subr.mxu1 %v3515_v10 }
  0x81   : > { %2710 = vmatpush3.msra.mxu0 %v3601_v46  ;;  %2746 = vmatpush3.msra.mxu1 %v3515_v10  ;;  %v364_v20 = vsub.f32 %v3851_v17, %v4697_v43  ;;  %v355_v33 = vand.u32 4294901760, %v354_v62 }
  0x82   : > { %2711 = vmatprep.subr.mxu0 %v3620_v53  ;;  %2747 = vmatprep.subr.mxu1 %v3517_v11 }
  0x83   : > { %2640 = vmatprep.mubr.f32.mxu0 %v335_v12  ;;  %2712 = vmatpush3.msra.mxu0 %v3620_v53  ;;  %v365_v43 = vand.u32 4294901760, %v364_v20  ;;  %v374_v12 = vsub.f32 %v3879_v19, %v373_v18 }
  0x84   : > { %2748 = vmatpush3.msra.mxu1 %v3517_v11  ;;  %2641 = vmatmul.mubr.f32.gmra.mxu0 %v345_v29  ;;  %v384_v29 = vsub.f32 %v3885_v37, %v383_v35 }
  0x85   : > { %2713 = vmatprep.subr.mxu0 %v3639_v60  ;;  %2749 = vmatprep.subr.mxu1 %v3526_v16  ;;  %v375_v62 = vand.u32 4294901760, %v374_v12  ;;  %v4709_v12 = vld [vmem:[#allocation21_spill] sm:$0xff] }
  0x86   : > { %2714 = vmatpush3.msra.mxu0 %v3639_v60  ;;  %2750 = vmatpush3.msra.mxu1 %v3526_v16  ;;  %v385_v20 = vand.u32 4294901760, %v384_v29 }
  0x87   : > { %2715 = vmatprep.subr.mxu0 %v3659_v6  ;;  %2751 = vmatprep.subr.mxu1 %v3548_v24 }
  0x88   : > { %2643 = vmatprep.mubr.f32.mxu0 %v355_v33  ;;  %2716 = vmatpush3.msra.mxu0 %v3659_v6  ;;  %v4698_v33 = vand.u32 4294901760, %v3676_v25 }
  0x89   : > { %2752 = vmatpush3.msra.mxu1 %v3548_v24  ;;  %2644 = vmatmul.mubr.f32.gmra.mxu0 %v365_v43  ;;  %v4699_v43 = vand.u32 4294901760, %v3687_v32 }
  0x8a   : > { %2684 = vmatprep.mubr.f32.mxu1 %v3790_v36  ;;  %2717 = vmatprep.subr.mxu0 %v3679_v30 }
  0x8b   : > { %2753 = vmatprep.subr.mxu1 %v3554_v27  ;;  %2685 = vmatmul.mubr.f32.gmra.mxu1 %v3795_v38 }
  0x8c   : > { %2718 = vmatpush3.msra.mxu0 %v3679_v30  ;;  %2754 = vmatpush3.msra.mxu1 %v3554_v27 }
  0x8d   : > { %2719 = vmatprep.subr.mxu0 %v3703_v48  ;;  %2755 = vmatprep.subr.mxu1 %v3573_v34 }
  0x8e   : > { %2646 = vmatprep.mubr.f32.mxu0 %v375_v62  ;;  %2720 = vmatpush3.msra.mxu0 %v3703_v48 }
  0x8f   : > { %2756 = vmatpush3.msra.mxu1 %v3573_v34  ;;  %2647 = vmatmul.mubr.f32.gmra.mxu0 %v385_v20 }
  0x90   : > { %2687 = vmatprep.mubr.f32.mxu1 %v3822_v15  ;;  %2721 = vmatprep.subr.mxu0 %v3719_v63 }
  0x91   : > { %2757 = vmatprep.subr.mxu1 %v3598_v45  ;;  %2688 = vmatmul.mubr.f32.gmra.mxu1 %v3827_v44 }
  0x92   : > { %2722 = vmatpush3.msra.mxu0 %v3719_v63  ;;  %2758 = vmatpush3.msra.mxu1 %v3598_v45 }
  0x93   : > { %2723 = vmatprep.subr.mxu0 %v3733_v59  ;;  %2759 = vmatprep.subr.mxu1 %v3605_v47 }
  0x94   : > { %2724 = vmatpush3.msra.mxu0 %v3733_v59  ;;  %2725 = vmatprep.mubr.f32.mxu0 %v3676_v25  ;;  %v4700_v25 = vand.u32 4294901760, %v3813_v0 }
  0x95   : > { %2760 = vmatpush3.msra.mxu1 %v3605_v47  ;;  %2690 = vmatprep.mubr.f32.mxu1 %v3856_v14 }
  0x96   : > { %2726 = vmatmul.mubr.f32.vlgmr.msra.gmra.mxu0 %v3687_v32  ;;  %2761 = vmatprep.subr.mxu1 %v3633_v57  ;;  %v4701_v32 = vand.u32 4294901760, %v3819_v50 }
  0x97   : > { %2781 = vmatprep.subr.mxu0 %v3540_v21  ;;  %2691 = vmatmul.mubr.f32.gmra.mxu1 %v3864_v56 }
  0x98   : > { %2762 = vmatpush3.msra.mxu1 %v3633_v57  ;;  %2782 = vmatpush3.msra.mxu0 %v3540_v21 }
  0x99   : > { %2763 = vmatprep.subr.mxu1 %v3665_v8  ;;  %2783 = vmatprep.subr.mxu0 %v3543_v22 }
  0x9a   : > { %2728 = vmatprep.mubr.f32.mxu0 %v3813_v0  ;;  %2764 = vmatpush3.msra.mxu1 %v3665_v8  ;;  %v4702_v0 = vand.u32 4294901760, %v3842_v49 }
  0x9b   : > { %2784 = vmatpush3.msra.mxu0 %v3543_v22  ;;  %2765 = vmatprep.subr.mxu1 %v3683_v31 }
  0x9c   : > { %2729 = vmatmul.mubr.f32.gmra.mxu0 %v3819_v50  ;;  %2785 = vmatprep.subr.mxu0 %v3546_v23  ;;  %v4703_v50 = vand.u32 4294901760, %v3851_v17 }
  0x9d   : > { %2766 = vmatpush3.msra.mxu1 %v3683_v31  ;;  %2786 = vmatpush3.msra.mxu0 %v3546_v23 }
  0x9e   : > { %2767 = vmatprep.subr.mxu1 %v3700_v41  ;;  %2787 = vmatprep.subr.mxu0 %v3552_v26 }
  0x9f   : > { %2731 = vmatprep.mubr.f32.mxu0 %v3842_v49  ;;  %2768 = vmatpush3.msra.mxu1 %v3700_v41  ;;  %v4706_v49 = vld [vmem:[#allocation19_spill] sm:$0xff] }
  0xa0   : > { %2769 = vmatprep.mubr.f32.mxu1 %v4698_v33  ;;  %2788 = vmatpush3.msra.mxu0 %v3552_v26 }
  0xa1   : > { %2732 = vmatmul.mubr.f32.gmra.mxu0 %v3851_v17  ;;  %2770 = vmatmul.mubr.f32.vlgmr.msra.gmra.mxu1 %v4699_v43  ;;  %v4704_v17 = vld [vmem:[#allocation26_spill] sm:$0xff] }
  0xa2   : > { %2789 = vmatprep.subr.mxu0 %v3557_v28  ;;  %2825 = vmatprep.subr.mxu1 %v3507_v3 }
  0xa3   : > { %2790 = vmatpush3.msra.mxu0 %v3557_v28  ;;  %2826 = vmatpush3.msra.mxu1 %v3507_v3 }
  0xa4   : > { %2791 = vmatprep.subr.mxu0 %v3583_v39  ;;  %2827 = vmatprep.subr.mxu1 %v3509_v4 }
  0xa5   : > { %2734 = vmatprep.mubr.f32.mxu0 %v3879_v19  ;;  %2772 = vmatprep.mubr.f32.mxu1 %v4700_v25  ;;  %v4708_v19 = vld [vmem:[#allocation24_spill] sm:$0xff] }
  0xa6   : > { %2792 = vmatpush3.msra.mxu0 %v3583_v39  ;;  %2828 = vmatpush3.msra.mxu1 %v3509_v4 }
  0xa7   : > { %2735 = vmatmul.mubr.f32.gmra.mxu0 %v3885_v37  ;;  %2773 = vmatmul.mubr.f32.gmra.mxu1 %v4701_v32  ;;  %v4705_v37 = vld [vmem:[#allocation18_spill] sm:$0xff] }
  0xa8   : > { %2793 = vmatprep.subr.mxu0 %v3589_v42  ;;  %2829 = vmatprep.subr.mxu1 %v3511_v5 }
  0xa9   : > { %2794 = vmatpush3.msra.mxu0 %v3589_v42  ;;  %2830 = vmatpush3.msra.mxu1 %v3511_v5 }
  0xaa   : > { %2795 = vmatprep.subr.mxu0 %v3617_v52  ;;  %2831 = vmatprep.subr.mxu1 %v3513_v9 }
  0xab   : > { %2775 = vmatprep.mubr.f32.mxu1 %v4702_v0  ;;  %2796 = vmatpush3.msra.mxu0 %v3617_v52 }
  0xac   : > { %2832 = vmatpush3.msra.mxu1 %v3513_v9  ;;  %2797 = vmatprep.subr.mxu0 %v3636_v58 }
  0xad   : > { %2776 = vmatmul.mubr.f32.gmra.mxu1 %v4703_v50  ;;  %2833 = vmatprep.subr.mxu1 %v3515_v10  ;;  %v4717_v50 = vld [vmem:[#allocation31_spill] sm:$0xff] }
  0xae   : > { %2798 = vmatpush3.msra.mxu0 %v3636_v58  ;;  %2834 = vmatpush3.msra.mxu1 %v3515_v10 }
  0xaf   : > { %2799 = vmatprep.subr.mxu0 %v3656_v1  ;;  %2835 = vmatprep.subr.mxu1 %v3517_v11 }
  0xb0   : > { %2778 = vmatprep.mubr.f32.mxu1 %v373_v18  ;;  %2800 = vmatpush3.msra.mxu0 %v3656_v1 }
  0xb1   : > { %2836 = vmatpush3.msra.mxu1 %v3517_v11  ;;  %2801 = vmatprep.subr.mxu0 %v3672_v13 }
  0xb2   : > { %2779 = vmatmul.mubr.f32.gmra.mxu1 %v383_v35  ;;  %2837 = vmatprep.subr.mxu1 %v3526_v16  ;;  %v1173_v35 = vmul.f32 %v4708_v19, %v4708_v19  ;;  %v4720_v19 = vld [vmem:[#allocation33_spill] sm:$0xff] }
  0xb3   : > { %2802 = vmatpush3.msra.mxu0 %v3672_v13  ;;  %2838 = vmatpush3.msra.mxu1 %v3526_v16 }
  0xb4   : > { %2803 = vmatprep.subr.mxu0 %v3696_v40  ;;  %2839 = vmatprep.subr.mxu1 %v3548_v24  ;;  %v4075_v62 = vand.u32 4294901760, %v1173_v35 }
  0xb5   : > { %2804 = vmatpush3.msra.mxu0 %v3696_v40  ;;  %2840 = vmatpush3.msra.mxu1 %v3548_v24 }
  0xb6   : > { %2805 = vmatprep.subr.mxu0 %v3713_v55  ;;  %2841 = vmatprep.subr.mxu1 %v3554_v27  ;;  %4711 = vst [vmem:[#allocation26_spill] sm:$0xff] %v4075_v62  ;;  %v4091_v33 = vsub.f32 %v1173_v35, %v4075_v62  ;;  %v4721_v35 = vld [vmem:[#allocation37_spill] sm:$0xff] }
  0xb7   : > { %2806 = vmatpush3.msra.mxu0 %v3713_v55  ;;  %2842 = vmatpush3.msra.mxu1 %v3554_v27 }
  0xb8   : > { %2807 = vmatprep.subr.mxu0 %v3730_v7  ;;  %2843 = vmatprep.subr.mxu1 %v3573_v34  ;;  %v4643_v25 = vand.u32 4294901760, %v4091_v33 }
  0xb9   : > { %2808 = vmatpush3.msra.mxu0 %v3730_v7  ;;  %2844 = vmatpush3.msra.mxu1 %v3573_v34 }
  0xba   : > { %2809 = vmatprep.subr.mxu0 %v3750_v54  ;;  %2845 = vmatprep.subr.mxu1 %v3598_v45  ;;  %v1274_v0 = vsub.f32 %v4091_v33, %v4643_v25 }
  0xbb   : > { %2810 = vmatpush3.msra.mxu0 %v3750_v54  ;;  %2846 = vmatpush3.msra.mxu1 %v3598_v45 }
  0xbc   : > { %2811 = vmatprep.subr.mxu0 %v3761_v51  ;;  %2847 = vmatprep.subr.mxu1 %v3605_v47 }
  0xbd   : > { %2812 = vmatpush3.msra.mxu0 %v3761_v51  ;;  %2813 = vmatprep.mubr.f32.mxu0 %v3642_v61 }
  0xbe   : > { %2848 = vmatpush3.msra.mxu1 %v3605_v47  ;;  %2814 = vmatmul.mubr.f32.vlgmr.msra.gmra.mxu0 %v4704_v17 }
  0xbf   : > { %2849 = vmatprep.subr.mxu1 %v3633_v57  ;;  %2869 = vmatprep.subr.mxu0 %v3507_v3 }
  0xc0   : > { %2850 = vmatpush3.msra.mxu1 %v3633_v57  ;;  %2870 = vmatpush3.msra.mxu0 %v3507_v3 }
  0xc1   : > { %2851 = vmatprep.subr.mxu1 %v3665_v8  ;;  %2871 = vmatprep.subr.mxu0 %v3509_v4 }
  0xc2   : > { %2816 = vmatprep.mubr.f32.mxu0 %v3790_v36  ;;  %2852 = vmatpush3.msra.mxu1 %v3665_v8 }
  0xc3   : > { %2872 = vmatpush3.msra.mxu0 %v3509_v4  ;;  %2853 = vmatprep.subr.mxu1 %v3683_v31 }
  0xc4   : > { %2817 = vmatmul.mubr.f32.gmra.mxu0 %v3795_v38  ;;  %2873 = vmatprep.subr.mxu0 %v3511_v5 }
  0xc5   : > { %2854 = vmatpush3.msra.mxu1 %v3683_v31  ;;  %2874 = vmatpush3.msra.mxu0 %v3511_v5 }
  0xc6   : > { %2855 = vmatprep.subr.mxu1 %v3700_v41  ;;  %2875 = vmatprep.subr.mxu0 %v3513_v9 }
  0xc7   : > { %2819 = vmatprep.mubr.f32.mxu0 %v3822_v15  ;;  %2856 = vmatpush3.msra.mxu1 %v3700_v41 }
  0xc8   : > { %2857 = vmatprep.mubr.f32.mxu1 %v3642_v61  ;;  %2876 = vmatpush3.msra.mxu0 %v3513_v9  ;;  %v4707_v61 = vld [vmem:[#allocation22_spill] sm:$0xff] }
  0xc9   : > { %2820 = vmatmul.mubr.f32.gmra.mxu0 %v3827_v44  ;;  %2858 = vmatmul.mubr.f32.vlgmr.msra.gmra.mxu1 %v4704_v17  ;;  %v1172_v18 = vmul.f32 %v4707_v61, %v4707_v61  ;;  %v4718_v17 = vld [vmem:[#allocation32_spill] sm:$0xff]  ;;  %v4719_v61 = vld [vmem:[#allocation35_spill] sm:$0xff] }
  0xca   : > { %2877 = vmatprep.subr.mxu0 %v3515_v10  ;;  %2913 = vmatprep.subr.mxu1 %v4705_v37 }
  0xcb   : > { %2878 = vmatpush3.msra.mxu0 %v3515_v10  ;;  %2914 = vmatpush3.msra.mxu1 %v4705_v37  ;;  %v4073_v29 = vand.u32 4294901760, %v1172_v18 }
  0xcc   : > { %2879 = vmatprep.subr.mxu0 %v3517_v11  ;;  %2915 = vmatprep.subr.mxu1 %v4706_v49 }
  0xcd   : > { %2822 = vmatprep.mubr.f32.mxu0 %v3856_v14  ;;  %2860 = vmatprep.mubr.f32.mxu1 %v3790_v36  ;;  %v4710_v36 = vld [vmem:[#allocation23_spill] sm:$0xff]  ;;  %v4086_v20 = vsub.f32 %v1172_v18, %v4073_v29  ;;  %v1174_v18 = vmul.f32 %v4719_v61, %v4719_v61 }
  0xce   : > { %2880 = vmatpush3.msra.mxu0 %v3517_v11  ;;  %2916 = vmatpush3.msra.mxu1 %v4706_v49  ;;  %v1275_v49 = vand.u32 4294901760, %v1274_v0  ;;  %v4726_v0 = vld [vmem:[#allocation12_spill] sm:$0xff] }
  0xcf   : > { %2823 = vmatmul.mubr.f32.gmra.mxu0 %v3864_v56  ;;  %2861 = vmatmul.mubr.f32.gmra.mxu1 %v3795_v38  ;;  %v4712_v38 = vld [vmem:[#allocation25_spill] sm:$0xff]  ;;  %v4644_v43 = vand.u32 4294901760, %v4086_v20 }
  0xd0   : > { %2881 = vmatprep.subr.mxu0 %v3526_v16  ;;  %2917 = vmatprep.subr.mxu1 %v4709_v12 }
  0xd1   : > { %2882 = vmatpush3.msra.mxu0 %v3526_v16  ;;  %2918 = vmatpush3.msra.mxu1 %v4709_v12  ;;  %v1264_v32 = vsub.f32 %v4086_v20, %v4644_v43  ;;  %v1175_v12 = vmul.f32 %v4721_v35, %v4721_v35  ;;  %v4736_v43 = vld [vmem:[#allocation20_spill] sm:$0xff] }
  0xd2   : > { %2883 = vmatprep.subr.mxu0 %v3548_v24  ;;  %2919 = vmatprep.subr.mxu1 %v4710_v36 }
  0xd3   : > { %2863 = vmatprep.mubr.f32.mxu1 %v3822_v15  ;;  %2884 = vmatpush3.msra.mxu0 %v3548_v24  ;;  %v4713_v15 = vld [vmem:[#allocation27_spill] sm:$0xff]  ;;  %v1265_v37 = vand.u32 4294901760, %v1264_v32  ;;  %v4725_v32 = vld [vmem:[#allocation36_spill] sm:$0xff] }
  0xd4   : > { %2920 = vmatpush3.msra.mxu1 %v4710_v36  ;;  %2885 = vmatprep.subr.mxu0 %v3554_v27  ;;  %v4722_v36 = vld [vmem:[#allocation34_spill] sm:$0xff] }
  0xd5   : > { %2864 = vmatmul.mubr.f32.gmra.mxu1 %v3827_v44  ;;  %2921 = vmatprep.subr.mxu1 %v4712_v38  ;;  %v4714_v44 = vld [vmem:[#allocation28_spill] sm:$0xff] }
  0xd6   : > { %2886 = vmatpush3.msra.mxu0 %v3554_v27  ;;  %2922 = vmatpush3.msra.mxu1 %v4712_v38  ;;  %v4723_v38 = vld [vmem:[#allocation11_spill] sm:$0xff] }
  0xd7   : > { %2887 = vmatprep.subr.mxu0 %v3573_v34  ;;  %2923 = vmatprep.subr.mxu1 %v4713_v15 }
  0xd8   : > { %2866 = vmatprep.mubr.f32.mxu1 %v3856_v14  ;;  %2888 = vmatpush3.msra.mxu0 %v3573_v34  ;;  %v4715_v14 = vld [vmem:[#allocation29_spill] sm:$0xff] }
  0xd9   : > { %2924 = vmatpush3.msra.mxu1 %v4713_v15  ;;  %2889 = vmatprep.subr.mxu0 %v3598_v45  ;;  %v4135_v15 = vand.u32 4294901760, %v1174_v18 }
  0xda   : > { %2867 = vmatmul.mubr.f32.gmra.mxu1 %v3864_v56  ;;  %2925 = vmatprep.subr.mxu1 %v4714_v44  ;;  %v4716_v56 = vld [vmem:[#allocation30_spill] sm:$0xff] }
  0xdb   : > { %2890 = vmatpush3.msra.mxu0 %v3598_v45  ;;  %2926 = vmatpush3.msra.mxu1 %v4714_v44  ;;  %v4139_v44 = vand.u32 4294901760, %v1175_v12  ;;  %v4152_v61 = vsub.f32 %v1174_v18, %v4135_v15  ;;  %v1178_v18 = vmul.f32 %v3835_v2, %v3835_v2 }
  0xdc   : > { %2891 = vmatprep.subr.mxu0 %v3605_v47  ;;  %2927 = vmatprep.subr.mxu1 %v4715_v14 }
  0xdd   : > { %2892 = vmatpush3.msra.mxu0 %v3605_v47  ;;  %2928 = vmatpush3.msra.mxu1 %v4715_v14  ;;  %v4724_v14 = vld [vmem:[#allocation40_spill] sm:$0xff] }
  0xde   : > { %2893 = vmatprep.subr.mxu0 %v3633_v57  ;;  %2929 = vmatprep.subr.mxu1 %v4716_v56 }
  0xdf   : > { %2894 = vmatpush3.msra.mxu0 %v3633_v57  ;;  %2930 = vmatpush3.msra.mxu1 %v4716_v56  ;;  %v1176_v56 = vmul.f32 %v4724_v14, %v4724_v14 }
  0xe0   : > { %2895 = vmatprep.subr.mxu0 %v3665_v8  ;;  %2931 = vmatprep.subr.mxu1 %v4717_v50 }
  0xe1   : > { %2896 = vmatpush3.msra.mxu0 %v3665_v8  ;;  %2932 = vmatpush3.msra.mxu1 %v4717_v50  ;;  %v4727_v50 = vld [vmem:[#allocation41_spill] sm:$0xff]  ;;  %v4159_v35 = vand.u32 4294901760, %v1176_v56 }
  0xe2   : > { %2897 = vmatprep.subr.mxu0 %v3683_v31  ;;  %2933 = vmatprep.subr.mxu1 %v4718_v17 }
  0xe3   : > { %2898 = vmatpush3.msra.mxu0 %v3683_v31  ;;  %2934 = vmatpush3.msra.mxu1 %v4718_v17  ;;  %v1177_v17 = vmul.f32 %v4727_v50, %v4727_v50  ;;  %v4733_v50 = vld [vmem:[#allocation15_spill] sm:$0xff] }
  0xe4   : > { %2899 = vmatprep.subr.mxu0 %v3700_v41  ;;  %2935 = vmatprep.subr.mxu1 %v4720_v19 }
  0xe5   : > { %2900 = vmatpush3.msra.mxu0 %v3700_v41  ;;  %2936 = vmatpush3.msra.mxu1 %v4720_v19  ;;  %v4157_v19 = vsub.f32 %v1175_v12, %v4139_v44  ;;  %v4163_v14 = vand.u32 4294901760, %v1177_v17  ;;  %v4645_v12 = vand.u32 4294901760, %v4152_v61 }
  0xe6   : > { %2901 = vmatprep.mubr.f32.mxu0 %v1265_v37  ;;  %2937 = vmatprep.subr.mxu1 %v4722_v36  ;;  %v4728_v37 = vld [vmem:[#allocation38_spill] sm:$0xff] }
  0xe7   : > { %2957 = vmatprep.subr.mxu0 %v4723_v38  ;;  %2902 = vmatmul.mubr.f32.vlgmr.msra.gmra.mxu0 %v1275_v49  ;;  %v4729_v49 = vld [vmem:[#allocation13_spill] sm:$0xff]  ;;  %v4183_v2 = vsub.f32 %v1177_v17, %v4163_v14 }
  0xe8   : > { %2938 = vmatpush3.msra.mxu1 %v4722_v36  ;;  %2958 = vmatpush3.msra.mxu0 %v4723_v38  ;;  %v4730_v36 = vld [vmem:[#allocation39_spill] sm:$0xff]  ;;  %v4731_v38 = vld [vmem:[#allocation14_spill] sm:$0xff] }
  0xe9   : > { %2939 = vmatprep.subr.mxu1 %v4725_v32  ;;  %2959 = vmatprep.subr.mxu0 %v4726_v0 }
  0xea   : > { %2940 = vmatpush3.msra.mxu1 %v4725_v32  ;;  %2960 = vmatpush3.msra.mxu0 %v4726_v0  ;;  %v4732_v32 = vld [vmem:[#allocation42_spill] sm:$0xff] }
  0xeb   : > { %2941 = vmatprep.subr.mxu1 %v4728_v37  ;;  %2961 = vmatprep.subr.mxu0 %v4729_v49  ;;  %v1179_v0 = vmul.f32 %v4732_v32, %v4732_v32 }
  0xec   : > { %2942 = vmatpush3.msra.mxu1 %v4728_v37  ;;  %2962 = vmatpush3.msra.mxu0 %v4729_v49  ;;  %v4646_v37 = vand.u32 4294901760, %v4157_v19  ;;  %v4178_v49 = vsub.f32 %v1176_v56, %v4159_v35  ;;  %v1284_v56 = vsub.f32 %v4152_v61, %v4645_v12 }
  0xed   : > { %2943 = vmatprep.subr.mxu1 %v4730_v36  ;;  %2963 = vmatprep.subr.mxu0 %v4731_v38  ;;  %v4194_v32 = vand.u32 4294901760, %v1179_v0 }
  0xee   : > { %2944 = vmatpush3.msra.mxu1 %v4730_v36  ;;  %2945 = vmatprep.mubr.f32.mxu1 %v4073_v29  ;;  %v4734_v36 = vld [vmem:[#allocation16_spill] sm:$0xff]  ;;  %v1294_v17 = vsub.f32 %v4157_v19, %v4646_v37  ;;  %v1285_v37 = vand.u32 4294901760, %v1284_v56 }
  0xef   : > { %2964 = vmatpush3.msra.mxu0 %v4731_v38  ;;  %2946 = vmatmul.mubr.f32.vlgmr.msra.gmra.mxu1 %v4075_v62  ;;  %v4187_v38 = vand.u32 4294901760, %v1178_v18  ;;  %v4213_v25 = vsub.f32 %v1179_v0, %v4194_v32 }
  0xf0   : > { %2965 = vmatprep.subr.mxu0 %v4733_v50  ;;  %3001 = vmatprep.subr.mxu1 %v3507_v3 }
  0xf1   : > { %2966 = vmatpush3.msra.mxu0 %v4733_v50  ;;  %3002 = vmatpush3.msra.mxu1 %v3507_v3  ;;  %v4735_v50 = vld [vmem:[#allocation17_spill] sm:$0xff]  ;;  %v4208_v12 = vsub.f32 %v1178_v18, %v4187_v38  ;;  %v1333_v56 = vand.u32 4294901760, %v4213_v25 }
  0xf2   : > { %2967 = vmatprep.subr.mxu0 %v4734_v36  ;;  %3003 = vmatprep.subr.mxu1 %v3509_v4 }
  0xf3   : > { %2968 = vmatpush3.msra.mxu0 %v4734_v36  ;;  %3004 = vmatpush3.msra.mxu1 %v3509_v4  ;;  %v4737_v36 = vand.u32 4294901760, %v4178_v49  ;;  %v1323_v0 = vand.u32 4294901760, %v4208_v12 }
  0xf4   : > { %2969 = vmatprep.subr.mxu0 %v4735_v50  ;;  %3005 = vmatprep.subr.mxu1 %v3511_v5 }
  0xf5   : > { %2970 = vmatpush3.msra.mxu0 %v4735_v50  ;;  %3006 = vmatpush3.msra.mxu1 %v3511_v5  ;;  %v1295_v50 = vand.u32 4294901760, %v1294_v17  ;;  %v1304_v62 = vsub.f32 %v4178_v49, %v4737_v36 }
  0xf6   : > { %2971 = vmatprep.subr.mxu0 %v4736_v43  ;;  %3007 = vmatprep.subr.mxu1 %v3513_v9 }
  0xf7   : > { %2972 = vmatpush3.msra.mxu0 %v4736_v43  ;;  %3008 = vmatpush3.msra.mxu1 %v3513_v9  ;;  %v4738_v43 = vand.u32 4294901760, %v4183_v2 }
  0xf8   : > { %2973 = vmatprep.subr.mxu0 %v3601_v46  ;;  %3009 = vmatprep.subr.mxu1 %v3515_v10 }
  0xf9   : > { %2974 = vmatpush3.msra.mxu0 %v3601_v46  ;;  %3010 = vmatpush3.msra.mxu1 %v3515_v10  ;;  %v1314_v18 = vsub.f32 %v4183_v2, %v4738_v43  ;;  %v1305_v46 = vand.u32 4294901760, %v1304_v62 }
  0xfa   : > { %2975 = vmatprep.subr.mxu0 %v3620_v53  ;;  %3011 = vmatprep.subr.mxu1 %v3517_v11 }
  0xfb   : > { %2904 = vmatprep.mubr.f32.mxu0 %v1285_v37  ;;  %2976 = vmatpush3.msra.mxu0 %v3620_v53  ;;  %v1315_v17 = vand.u32 4294901760, %v1314_v18  ;;  %v1324_v37 = vsub.f32 %v4208_v12, %v1323_v0  ;;  %v1334_v53 = vsub.f32 %v4213_v25, %v1333_v56 }
  0xfc   : > { %3012 = vmatpush3.msra.mxu1 %v3517_v11  ;;  %2905 = vmatmul.mubr.f32.gmra.mxu0 %v1295_v50 }
  0xfd   : > { %2977 = vmatprep.subr.mxu0 %v3639_v60  ;;  %3013 = vmatprep.subr.mxu1 %v3526_v16  ;;  %v1335_v62 = vand.u32 4294901760, %v1334_v53 }
  0xfe   : > { %2978 = vmatpush3.msra.mxu0 %v3639_v60  ;;  %3014 = vmatpush3.msra.mxu1 %v3526_v16  ;;  %v1325_v60 = vand.u32 4294901760, %v1324_v37 }
  0xff   : > { %2979 = vmatprep.subr.mxu0 %v3659_v6  ;;  %3015 = vmatprep.subr.mxu1 %v3548_v24 }
 0x100   : > { %2907 = vmatprep.mubr.f32.mxu0 %v1305_v46  ;;  %2980 = vmatpush3.msra.mxu0 %v3659_v6 }
 0x101   : > { %3016 = vmatpush3.msra.mxu1 %v3548_v24  ;;  %2908 = vmatmul.mubr.f32.gmra.mxu0 %v1315_v17 }
 0x102   : > { %2948 = vmatprep.mubr.f32.mxu1 %v4135_v15  ;;  %2981 = vmatprep.subr.mxu0 %v3679_v30 }
 0x103   : > { %3017 = vmatprep.subr.mxu1 %v3554_v27  ;;  %2949 = vmatmul.mubr.f32.gmra.mxu1 %v4139_v44 }
 0x104   : > { %2982 = vmatpush3.msra.mxu0 %v3679_v30  ;;  %3018 = vmatpush3.msra.mxu1 %v3554_v27 }
 0x105   : > { %2983 = vmatprep.subr.mxu0 %v3703_v48  ;;  %3019 = vmatprep.subr.mxu1 %v3573_v34 }
 0x106   : > { %2910 = vmatprep.mubr.f32.mxu0 %v1325_v60  ;;  %2984 = vmatpush3.msra.mxu0 %v3703_v48 }
 0x107   : > { %3020 = vmatpush3.msra.mxu1 %v3573_v34  ;;  %2911 = vmatmul.mubr.f32.gmra.mxu0 %v1335_v62 }
 0x108   : > { %2951 = vmatprep.mubr.f32.mxu1 %v4159_v35  ;;  %2985 = vmatprep.subr.mxu0 %v3719_v63 }
 0x109   : > { %3021 = vmatprep.subr.mxu1 %v3598_v45  ;;  %2952 = vmatmul.mubr.f32.gmra.mxu1 %v4163_v14 }
 0x10a   : > { %2986 = vmatpush3.msra.mxu0 %v3719_v63  ;;  %3022 = vmatpush3.msra.mxu1 %v3598_v45 }
 0x10b   : > { %2987 = vmatprep.subr.mxu0 %v3733_v59  ;;  %3023 = vmatprep.subr.mxu1 %v3605_v47 }
 0x10c   : > { %2988 = vmatpush3.msra.mxu0 %v3733_v59  ;;  %2989 = vmatprep.mubr.f32.mxu0 %v4086_v20 }
 0x10d   : > { %3024 = vmatpush3.msra.mxu1 %v3605_v47  ;;  %2954 = vmatprep.mubr.f32.mxu1 %v4187_v38 }
 0x10e   : > { %2990 = vmatmul.mubr.f32.vlgmr.msra.gmra.mxu0 %v4091_v33  ;;  %3025 = vmatprep.subr.mxu1 %v3633_v57 }
 0x10f   : > { %3045 = vmatprep.subr.mxu0 %v3540_v21  ;;  %2955 = vmatmul.mubr.f32.gmra.mxu1 %v4194_v32 }
 0x110   : > { %3026 = vmatpush3.msra.mxu1 %v3633_v57  ;;  %3046 = vmatpush3.msra.mxu0 %v3540_v21  ;;  %v4739_v21 = vand.u32 4294901760, %v4086_v20 }
 0x111   : > { %3027 = vmatprep.subr.mxu1 %v3665_v8  ;;  %3047 = vmatprep.subr.mxu0 %v3543_v22 }
 0x112   : > { %2992 = vmatprep.mubr.f32.mxu0 %v4152_v61  ;;  %3028 = vmatpush3.msra.mxu1 %v3665_v8 }
 0x113   : > { %3048 = vmatpush3.msra.mxu0 %v3543_v22  ;;  %3029 = vmatprep.subr.mxu1 %v3683_v31  ;;  %v4740_v22 = vand.u32 4294901760, %v4091_v33 }
 0x114   : > { %2993 = vmatmul.mubr.f32.gmra.mxu0 %v4157_v19  ;;  %3049 = vmatprep.subr.mxu0 %v3546_v23 }
 0x115   : > { %3030 = vmatpush3.msra.mxu1 %v3683_v31  ;;  %3050 = vmatpush3.msra.mxu0 %v3546_v23  ;;  %v4741_v23 = vand.u32 4294901760, %v4152_v61 }
 0x116   : > { %3031 = vmatprep.subr.mxu1 %v3700_v41  ;;  %3051 = vmatprep.subr.mxu0 %v3552_v26 }
 0x117   : > { %2995 = vmatprep.mubr.f32.mxu0 %v4178_v49  ;;  %3032 = vmatpush3.msra.mxu1 %v3700_v41 }
 0x118   : > { %3033 = vmatprep.mubr.f32.mxu1 %v4739_v21  ;;  %3052 = vmatpush3.msra.mxu0 %v3552_v26  ;;  %v4742_v26 = vand.u32 4294901760, %v4157_v19 }
 0x119   : > { %2996 = vmatmul.mubr.f32.gmra.mxu0 %v4183_v2  ;;  %3034 = vmatmul.mubr.f32.vlgmr.msra.gmra.mxu1 %v4740_v22 }
 0x11a   : > { %3053 = vmatprep.subr.mxu0 %v3557_v28  ;;  %3089 = vmatprep.subr.mxu1 %v3507_v3 }
 0x11b   : > { %3054 = vmatpush3.msra.mxu0 %v3557_v28  ;;  %3090 = vmatpush3.msra.mxu1 %v3507_v3  ;;  %v4743_v3 = vmov %v4737_v36 }
 0x11c   : > { %3055 = vmatprep.subr.mxu0 %v3583_v39  ;;  %3091 = vmatprep.subr.mxu1 %v3509_v4 }
 0x11d   : > { %2998 = vmatprep.mubr.f32.mxu0 %v4208_v12  ;;  %3036 = vmatprep.mubr.f32.mxu1 %v4741_v23 }
 0x11e   : > { %3056 = vmatpush3.msra.mxu0 %v3583_v39  ;;  %3092 = vmatpush3.msra.mxu1 %v3509_v4  ;;  %v4744_v4 = vmov %v4738_v43 }
 0x11f   : > { %2999 = vmatmul.mubr.f32.gmra.mxu0 %v4213_v25  ;;  %3037 = vmatmul.mubr.f32.gmra.mxu1 %v4742_v26 }
 0x120   : > { %3057 = vmatprep.subr.mxu0 %v3589_v42  ;;  %3093 = vmatprep.subr.mxu1 %v3511_v5 }
 0x121   : > { %3058 = vmatpush3.msra.mxu0 %v3589_v42  ;;  %3094 = vmatpush3.msra.mxu1 %v3511_v5 }
 0x122   : > { %3059 = vmatprep.subr.mxu0 %v3617_v52  ;;  %3095 = vmatprep.subr.mxu1 %v3513_v9 }
 0x123   : > { %3039 = vmatprep.mubr.f32.mxu1 %v4743_v3  ;;  %3060 = vmatpush3.msra.mxu0 %v3617_v52 }
 0x124   : > { %3096 = vmatpush3.msra.mxu1 %v3513_v9  ;;  %3061 = vmatprep.subr.mxu0 %v3636_v58  ;;  %v4745_v9 = vld [vmem:[#allocation26_spill] sm:$0xff] }
 0x125   : > { %3040 = vmatmul.mubr.f32.gmra.mxu1 %v4744_v4  ;;  %3097 = vmatprep.subr.mxu1 %v3515_v10 }
 0x126   : > { %3062 = vmatpush3.msra.mxu0 %v3636_v58  ;;  %3098 = vmatpush3.msra.mxu1 %v3515_v10 }
 0x127   : > { %3063 = vmatprep.subr.mxu0 %v3656_v1  ;;  %3099 = vmatprep.subr.mxu1 %v3517_v11 }
 0x128   : > { %3042 = vmatprep.mubr.f32.mxu1 %v1323_v0  ;;  %3064 = vmatpush3.msra.mxu0 %v3656_v1 }
 0x129   : > { %3100 = vmatpush3.msra.mxu1 %v3517_v11  ;;  %3065 = vmatprep.subr.mxu0 %v3672_v13 }
 0x12a   : > { %3043 = vmatmul.mubr.f32.gmra.mxu1 %v1333_v56  ;;  %3101 = vmatprep.subr.mxu1 %v3526_v16 }
 0x12b   : > { %3066 = vmatpush3.msra.mxu0 %v3672_v13  ;;  %3102 = vmatpush3.msra.mxu1 %v3526_v16 }
 0x12c   : > { %3067 = vmatprep.subr.mxu0 %v3696_v40  ;;  %3103 = vmatprep.subr.mxu1 %v3548_v24 }
 0x12d   : > { %3068 = vmatpush3.msra.mxu0 %v3696_v40  ;;  %3104 = vmatpush3.msra.mxu1 %v3548_v24 }
 0x12e   : > { %3069 = vmatprep.subr.mxu0 %v3713_v55  ;;  %3105 = vmatprep.subr.mxu1 %v3554_v27 }
 0x12f   : > { %3070 = vmatpush3.msra.mxu0 %v3713_v55  ;;  %3106 = vmatpush3.msra.mxu1 %v3554_v27  ;;  %v2639_v5 = vpop.f32.mrf.mxu0 }
 0x130   : > { %3071 = vmatprep.subr.mxu0 %v3730_v7  ;;  %3107 = vmatprep.subr.mxu1 %v3573_v34 }
 0x131   : > { %3072 = vmatpush3.msra.mxu0 %v3730_v7  ;;  %3108 = vmatpush3.msra.mxu1 %v3573_v34  ;;  %v317_v16 = vpop.f32.mrf.mxu0 }
 0x132   : > { %3073 = vmatprep.subr.mxu0 %v3750_v54  ;;  %3109 = vmatprep.subr.mxu1 %v3598_v45 }
 0x133   : > { %3074 = vmatpush3.msra.mxu0 %v3750_v54  ;;  %3110 = vmatpush3.msra.mxu1 %v3598_v45 }
 0x134   : > { %3075 = vmatprep.subr.mxu0 %v3761_v51  ;;  %3111 = vmatprep.subr.mxu1 %v3605_v47 }
 0x135   : > { %3076 = vmatpush3.msra.mxu0 %v3761_v51  ;;  %3077 = vmatprep.mubr.f32.mxu0 %v4073_v29 }
 0x136   : > { %3112 = vmatpush3.msra.mxu1 %v3605_v47  ;;  %3078 = vmatmul.mubr.f32.vlgmr.msra.gmra.mxu0 %v4745_v9 }
 0x137   : > { %3113 = vmatprep.subr.mxu1 %v3633_v57  ;;  %3080 = vmatprep.mubr.f32.mxu0 %v4135_v15  ;;  %v2683_v10 = vpop.f32.mrf.mxu1 }
 0x138   : > { %3114 = vmatpush3.msra.mxu1 %v3633_v57  ;;  %3121 = vmatprep.mubr.f32.mxu1 %v4073_v29  ;;  %v4361_v11 = vadd.f32 %v2683_v10, %v2639_v5 }
 0x139   : > { %3115 = vmatprep.subr.mxu1 %v3665_v8  ;;  %v538_v24 = vpop.f32.mrf.mxu1 }
 0x13a   : > { %3116 = vmatpush3.msra.mxu1 %v3665_v8  ;;  %3081 = vmatmul.mubr.f32.gmra.mxu0 %v4139_v44  ;;  %v4366_v27 = vadd.f32 %v538_v24, %v317_v16 }
 0x13b   : > { %3117 = vmatprep.subr.mxu1 %v3683_v31  ;;  %3083 = vmatprep.mubr.f32.mxu0 %v4159_v35 }
 0x13c   : > { %3118 = vmatpush3.msra.mxu1 %v3683_v31 }
 0x13d   : > { %3119 = vmatprep.subr.mxu1 %v3700_v41 }
 0x13e   : > { %3120 = vmatpush3.msra.mxu1 %v3700_v41  ;;  %3084 = vmatmul.mubr.f32.gmra.mxu0 %v4163_v14 }
 0x13f   : > { %3122 = vmatmul.mubr.f32.vlgmr.msra.gmra.mxu1 %v4745_v9  ;;  %3086 = vmatprep.mubr.f32.mxu0 %v4187_v38 }
 0x140   : > { %3124 = vmatprep.mubr.f32.mxu1 %v4135_v15 }
 0x142   : > { %3087 = vmatmul.mubr.f32.gmra.mxu0 %v4194_v32 }
 0x143   : > { %3125 = vmatmul.mubr.f32.gmra.mxu1 %v4139_v44 }
 0x144   : > { %3127 = vmatprep.mubr.f32.mxu1 %v4159_v35  ;;  %v2642_v28 = vpop.f32.mrf.mxu0 }
 0x146   : > { %v337_v34 = vpop.f32.mrf.mxu0 }
 0x147   : > { %3128 = vmatmul.mubr.f32.gmra.mxu1 %v4163_v14 }
 0x148   : > { %3130 = vmatprep.mubr.f32.mxu1 %v4187_v38 }
 0x149   : > { %v2645_v45 = vpop.f32.mrf.mxu0 }
 0x14b   : > { %3131 = vmatmul.mubr.f32.gmra.mxu1 %v4194_v32  ;;  %v2686_v39 = vpop.f32.mrf.mxu1  ;;  %v357_v54 = vpop.f32.mrf.mxu0 }
 0x14c   : > { %v4383_v42 = vadd.f32 %v2686_v39, %v2642_v28 }
 0x14d   : > { %v550_v47 = vpop.f32.mrf.mxu1 }
 0x14e   : > { %v4385_v52 = vadd.f32 %v550_v47, %v337_v34 }
 0x14f   : > { %v2648_v1 = vpop.f32.mrf.mxu0 }
 0x151   : > { %v2689_v55 = vpop.f32.mrf.mxu1  ;;  %v377_v8 = vpop.f32.mrf.mxu0 }
 0x152   : > { %v4387_v57 = vadd.f32 %v2689_v55, %v2645_v45 }
 0x153   : > { %v562_v58 = vpop.f32.mrf.mxu1 }
 0x154   : > { %v4389_v63 = vadd.f32 %v562_v58, %v357_v54 }
 0x156   : > { %v2727_v31 = vpop.f32.mrf.mxu0 }
 0x157   : > { %v2692_v6 = vpop.f32.mrf.mxu1 }
 0x158   : > { %v4391_v7 = vadd.f32 %v2692_v6, %v2648_v1  ;;  %v684_v40 = vpop.f32.mrf.mxu0 }
 0x159   : > { %v574_v13 = vpop.f32.mrf.mxu1 }
 0x15a   : > { %v4393_v30 = vadd.f32 %v574_v13, %v377_v8 }
 0x15c   : > { %v2730_v41 = vpop.f32.mrf.mxu0 }
 0x15e   : > { %v698_v51 = vpop.f32.mrf.mxu0 }
 0x161   : > { %v2771_v48 = vpop.f32.mrf.mxu1  ;;  %v2733_v29 = vpop.f32.mrf.mxu0 }
 0x163   : > { %v822_v59 = vpop.f32.mrf.mxu1  ;;  %v4395_v33 = vpop.f32.mrf.mxu0 }
 0x167   : > { %v2774_v20 = vpop.f32.mrf.mxu1  ;;  %v4397_v15 = vpop.f32.mrf.mxu0 }
 0x169   : > { %v838_v25 = vpop.f32.mrf.mxu1  ;;  %v4399_v61 = vpop.f32.mrf.mxu0 }
 0x16d   : > { %v2777_v44 = vpop.f32.mrf.mxu1 }
 0x16f   : > { %v4401_v35 = vpop.f32.mrf.mxu1 }
 0x172   : > { %v4403_v12 = vpop.f32.mrf.mxu1 }
 0x174   : > { %v4405_v2 = vpop.f32.mrf.mxu1 }
 0x17e   : > { %v2815_v19 = vpop.f32.mrf.mxu0 }
 0x180   : > { %v997_v14 = vpop.f32.mrf.mxu0 }
 0x184   : > { %v2818_v49 = vpop.f32.mrf.mxu0 }
 0x186   : > { %v1009_v32 = vpop.f32.mrf.mxu0 }
 0x189   : > { %v2859_v38 = vpop.f32.mrf.mxu1  ;;  %v2821_v50 = vpop.f32.mrf.mxu0 }
 0x18b   : > { %v1126_v36 = vpop.f32.mrf.mxu1  ;;  %v4407_v18 = vpop.f32.mrf.mxu0 }
 0x18f   : > { %v2862_v43 = vpop.f32.mrf.mxu1  ;;  %v4409_v56 = vpop.f32.mrf.mxu0 }
 0x191   : > { %v1138_v0 = vpop.f32.mrf.mxu1  ;;  %v4411_v17 = vpop.f32.mrf.mxu0 }
 0x192   : > { %4746 = vst [vmem:[#allocation18_spill] sm:$0xff] %v4411_v17 }
 0x195   : > { %v2865_v46 = vpop.f32.mrf.mxu1 }
 0x197   : > { %v4413_v53 = vpop.f32.mrf.mxu1 }
 0x19a   : > { %v4415_v62 = vpop.f32.mrf.mxu1 }
 0x19b   : > { %4747 = vst [vmem:[#allocation19_spill] sm:$0xff] %v4415_v62 }
 0x19c   : > { %v4419_v22 = vpop.f32.mrf.mxu1 }
 0x19d   : > { %4748 = vst [vmem:[#allocation22_spill] sm:$0xff] %v4419_v22  ;;  %v692_v22 = vadd.f32 %v2727_v31, %v4361_v11 }
 0x1a7   : > { %v2903_v37 = vpop.f32.mrf.mxu0 }
 0x1a9   : > { %v1267_v60 = vpop.f32.mrf.mxu0 }
 0x1af   : > { %v2947_v26 = vpop.f32.mrf.mxu1 }
 0x1b1   : > { %v1488_v4 = vpop.f32.mrf.mxu1 }
 0x1bc   : > { %v4417_v21 = vpop.f32.mrf.mxu0 }
 0x1be   : > { %v4421_v23 = vpop.f32.mrf.mxu0 }
 0x1c1   : > { %v4423_v3 = vpop.f32.mrf.mxu0 }
 0x1c2   : > { %4749 = vst [vmem:[#allocation24_spill] sm:$0xff] %v4423_v3  ;;  %v831_v3 = vadd.f32 %v2771_v48, %v692_v22 }
 0x1c3   : > { %v2950_v5 = vpop.f32.mrf.mxu1  ;;  %v4425_v9 = vpop.f32.mrf.mxu0 }
 0x1c4   : > { %4750 = vst [vmem:[#allocation21_spill] sm:$0xff] %v4425_v9  ;;  %v699_v9 = vadd.f32 %v698_v51, %v4385_v52 }
 0x1c5   : > { %v4427_v10 = vpop.f32.mrf.mxu1 }
 0x1c7   : > { %v4429_v16 = vpop.f32.mrf.mxu0 }
 0x1c8   : > { %4751 = vst [vmem:[#allocation23_spill] sm:$0xff] %v4429_v16 }
 0x1c9   : > { %v4431_v24 = vpop.f32.mrf.mxu1  ;;  %v4433_v28 = vpop.f32.mrf.mxu0 }
 0x1ca   : > { %4752 = vst [vmem:[#allocation25_spill] sm:$0xff] %v4431_v24  ;;  %4753 = vst [vmem:[#allocation27_spill] sm:$0xff] %v4433_v28  ;;  %v720_v24 = vadd.f32 %v2733_v29, %v4387_v57  ;;  %v713_v57 = vadd.f32 %v4395_v33, %v4389_v63  ;;  %v734_v29 = vadd.f32 %v4397_v15, %v4391_v7 }
 0x1cb   : > { %v4435_v34 = vpop.f32.mrf.mxu1  ;;  %v1489_v63 = vadd.f32 %v1488_v4, %v1267_v60 }
 0x1cc   : > { %4754 = vst [vmem:[#allocation28_spill] sm:$0xff] %v4435_v34  ;;  %v706_v34 = vadd.f32 %v2730_v41, %v4383_v42 }
 0x1ce   : > { %v2991_v39 = vpop.f32.mrf.mxu0 }
 0x1cf   : > { %v4437_v45 = vpop.f32.mrf.mxu1 }
 0x1d0   : > { %4755 = vst [vmem:[#allocation29_spill] sm:$0xff] %v4437_v45  ;;  %v1634_v47 = vpop.f32.mrf.mxu0  ;;  %v685_v45 = vadd.f32 %v684_v40, %v4366_v27 }
 0x1d1   : > { %v4439_v54 = vpop.f32.mrf.mxu1 }
 0x1d2   : > { %4756 = vst [vmem:[#allocation30_spill] sm:$0xff] %v4439_v54 }
 0x1d4   : > { %v2994_v55 = vpop.f32.mrf.mxu0 }
 0x1d6   : > { %v4441_v1 = vpop.f32.mrf.mxu0 }
 0x1d7   : > { %4757 = vst [vmem:[#allocation31_spill] sm:$0xff] %v4441_v1  ;;  %v863_v1 = vadd.f32 %v2777_v44, %v720_v24  ;;  %v855_v44 = vadd.f32 %v4401_v35, %v713_v57  ;;  %v1507_v35 = vadd.f32 %v2950_v5, %v4417_v21 }
 0x1d9   : > { %v3035_v58 = vpop.f32.mrf.mxu1  ;;  %v4443_v8 = vpop.f32.mrf.mxu0  ;;  %v1028_v42 = vadd.f32 %v2821_v50, %v863_v1  ;;  %v1022_v50 = vadd.f32 %v4407_v18, %v855_v44  ;;  %v1501_v18 = vadd.f32 %v4427_v10, %v4421_v23  ;;  %v1656_v60 = vadd.f32 %v2994_v55, %v1507_v35  ;;  %v4766_v23 = vld [vmem:[#allocation19_spill] sm:$0xff]  ;;  %v4767_v55 = vld [vmem:[#allocation24_spill] sm:$0xff] }
 0x1da   : > { %4758 = vst [vmem:[#allocation32_spill] sm:$0xff] %v4443_v8  ;;  %v823_v8 = vadd.f32 %v822_v59, %v685_v45 }
 0x1db   : > { %v1772_v6 = vpop.f32.mrf.mxu1  ;;  %v4447_v16 = vpop.f32.mrf.mxu0  ;;  %v1157_v59 = vadd.f32 %v2865_v46, %v1028_v42  ;;  %v1635_v46 = vadd.f32 %v1634_v47, %v1489_v63 }
 0x1dc   : > { %4760 = vst [vmem:[#allocation33_spill] sm:$0xff] %v4447_v16  ;;  %v839_v16 = vadd.f32 %v838_v25, %v699_v9  ;;  %v998_v17 = vadd.f32 %v997_v14, %v823_v8 }
 0x1dd   : > { %v2127_v15 = vmul.f32 0.03125, %v1157_v59 }
 0x1de   : > { %v1010_v27 = vadd.f32 %v1009_v32, %v839_v16  ;;  %v1127_v41 = vadd.f32 %v1126_v36, %v998_v17  ;;  %v879_v32 = vadd.f32 %v4403_v12, %v734_v29  ;;  %v4763_v16 = vld [vmem:[#allocation18_spill] sm:$0xff]  ;;  %v4773_v29 = vld [vmem:[#allocation23_spill] sm:$0xff] }
 0x1df   : > { %v4445_v13 = vpop.f32.mrf.mxu1  ;;  %v4454_v54 = vpop.f32.mrf.mxu0  ;;  %v4482_v24 = vmul.f32 %v2127_v15, %v2127_v15  ;;  %v4777_v15 = vld [vmem:[#allocation27_spill] sm:$0xff] }
 0x1e0   : > { %4759 = vst [vmem:[#allocation35_spill] sm:$0xff] %v4445_v13  ;;  %4762 = vst [vmem:[#allocation34_spill] sm:$0xff] %v4454_v54  ;;  %v847_v13 = vadd.f32 %v2774_v20, %v706_v34  ;;  %v1139_v51 = vadd.f32 %v1138_v0, %v1010_v27  ;;  %v1495_v20 = vadd.f32 %v2947_v26, %v2903_v37  ;;  %v2122_v14 = vmul.f32 0.03125, %v1127_v41  ;;  %v4764_v34 = vld [vmem:[#allocation31_spill] sm:$0xff] }
 0x1e1   : > { %v4449_v28 = vpop.f32.mrf.mxu1  ;;  %v4460_v31 = vpop.f32.mrf.mxu0  ;;  %v4775_v44 = vld [vmem:[#allocation32_spill] sm:$0xff] }
 0x1e2   : > { %4761 = vst [vmem:[#allocation37_spill] sm:$0xff] %v4449_v28  ;;  %v1004_v28 = vadd.f32 %v2815_v19, %v831_v3  ;;  %v1016_v11 = vadd.f32 %v2818_v49, %v847_v13  ;;  %v1642_v33 = vadd.f32 %v2991_v39, %v1495_v20  ;;  %v2124_v7 = vmul.f32 0.03125, %v1139_v51  ;;  %v4769_v13 = vld [vmem:[#allocation21_spill] sm:$0xff]  ;;  %v4772_v51 = vld [vmem:[#allocation22_spill] sm:$0xff] }
 0x1e3   : > { %v2138_v26 = vmul.f32 %v2122_v14, %v2122_v14  ;;  %v1773_v3 = vadd.f32 %v1772_v6, %v1635_v46  ;;  %v1649_v39 = vadd.f32 %v4764_v34, %v1501_v18  ;;  %v4768_v6 = vld [vmem:[#allocation25_spill] sm:$0xff] }
 0x1e4   : > { %v1133_v40 = vadd.f32 %v2859_v38, %v1004_v28  ;;  %v1145_v48 = vadd.f32 %v2862_v43, %v1016_v11  ;;  %v727_v38 = vadd.f32 %v4399_v61, %v4393_v30  ;;  %v1781_v17 = vadd.f32 %v3035_v58, %v1642_v33  ;;  %v4770_v11 = vld [vmem:[#allocation28_spill] sm:$0xff]  ;;  %v4774_v20 = vld [vmem:[#allocation29_spill] sm:$0xff] }
 0x1e5   : > { %v4458_v62 = vpop.f32.mrf.mxu1  ;;  %v1040_v30 = vadd.f32 %v4409_v56, %v879_v32  ;;  %v1151_v61 = vadd.f32 %v4413_v53, %v1022_v50  ;;  %v2140_v5 = vmul.f32 %v2124_v7, %v2124_v7  ;;  %v1519_v8 = vadd.f32 %v4768_v6, %v4767_v55  ;;  %v4776_v14 = vld [vmem:[#allocation33_spill] sm:$0xff] }
 0x1e6   : > { %v2123_v19 = vmul.f32 0.03125, %v1133_v40  ;;  %v2125_v43 = vmul.f32 0.03125, %v1145_v48  ;;  %v871_v0 = vadd.f32 %v4405_v2, %v727_v38  ;;  %v1513_v27 = vadd.f32 %v4770_v11, %v4769_v13 }
 0x1e7   : > { %v4462_v54 = vpop.f32.mrf.mxu1  ;;  %v4765_v56 = vld [vmem:[#allocation35_spill] sm:$0xff]  ;;  %v2126_v1 = vmul.f32 0.03125, %v1151_v61  ;;  %v1169_v10 = vadd.f32 %v4766_v23, %v1040_v30  ;;  %v4779_v35 = vld [vmem:[#allocation34_spill] sm:$0xff] }
 0x1e8   : > { %v2139_v22 = vmul.f32 %v2123_v19, %v2123_v19  ;;  %v2141_v2 = vmul.f32 %v2125_v43, %v2125_v43  ;;  %v1034_v21 = vadd.f32 %v4763_v16, %v871_v0  ;;  %v1797_v45 = vadd.f32 %v4765_v56, %v1656_v60  ;;  %v4778_v0 = vld [vmem:[#allocation30_spill] sm:$0xff] }
 0x1e9   : > { %v4771_v40 = vld [vmem:[#allocation37_spill] sm:$0xff]  ;;  %v1670_v19 = vadd.f32 %v4775_v44, %v1519_v8  ;;  %v1663_v38 = vadd.f32 %v4776_v14, %v1513_v27 }
 0x1ea   : > { %v4469_v49 = vpop.f32.mrf.mxu1  ;;  %v1789_v41 = vadd.f32 %v4771_v40, %v1649_v39  ;;  %v1163_v59 = vadd.f32 %v4772_v51, %v1034_v21 }
 0x1eb   : > { %v1805_v30 = vadd.f32 %v4462_v54, %v1663_v38  ;;  %v3211_v38 = vld [vmem:[%s3497_s23] sm:$0xff] }
 0x1ec   : > { %v1820_v12 = vpop.f32.mrf.mxu1  ;;  %v2128_v8 = vmul.f32 0.03125, %v1163_v59 }
 0x1f6   : > { %v3079_v52 = vpop.f32.mrf.mxu0 }
 0x1f7   : > { %v1954_v4 = vadd.f32 %v3079_v52, %v1781_v17  ;;  %v1813_v17 = vadd.f32 %v4458_v62, %v1670_v19  ;;  %v2129_v62 = vmul.f32 0.03125, %v1169_v10 }
 0x1f8   : > { %v1947_v25 = vpop.f32.mrf.mxu0 }
 0x1f9   : > { %v1948_v53 = vadd.f32 %v1947_v25, %v1773_v3  ;;  %v1531_v25 = vadd.f32 %v4774_v20, %v4773_v29  ;;  %v2145_v27 = vmul.f32 %v2129_v62, %v2129_v62  ;;  %v2309_v20 = vld [vmem:[%s4579_s1] ss:$0 sm:$0xff] }
 0x1fa   : > { %v3082_v36 = vpop.f32.mrf.mxu0 }
 0x1fb   : > { %v1966_v52 = vadd.f32 %v3082_v36, %v1797_v45  ;;  %v1525_v36 = vadd.f32 %v4778_v0, %v4777_v15  ;;  %v1684_v46 = vadd.f32 %v4779_v35, %v1531_v25  ;;  %v3210_v25 = vld [vmem:[%s3497_s23 + $0x8] sm:$0xff]  ;;  %v3213_v0 = vld [vmem:[%s3497_s23 + $0x10] sm:$0xff] }
 0x1fc   : > { %v1959_v37 = vpop.f32.mrf.mxu0 }
 0x1fd   : > { %v1960_v63 = vadd.f32 %v1959_v37, %v1789_v41  ;;  %v1677_v37 = vadd.f32 %v4460_v31, %v1525_v36  ;;  %v2142_v31 = vmul.f32 %v2126_v1, %v2126_v1 }
 0x1fe   : > { %v3085_v9 = vpop.f32.mrf.mxu0 }
 0x1ff   : > { %v3123_v28 = vpop.f32.mrf.mxu1  ;;  %v1978_v16 = vadd.f32 %v3085_v9, %v1813_v17 }
 0x200   : > { %v2083_v47 = vadd.f32 %v3123_v28, %v1954_v4  ;;  %v1971_v58 = vpop.f32.mrf.mxu0 }
 0x201   : > { %v2076_v42 = vpop.f32.mrf.mxu1  ;;  %v1972_v21 = vadd.f32 %v1971_v58, %v1805_v30  ;;  %v3214_v30 = vld [vmem:[%s3497_s23 + $0x28] sm:$0xff] }
 0x202   : > { %v2131_v57 = vmul.f32 0.03125, %v2083_v47  ;;  %v2077_v48 = vadd.f32 %v2076_v42, %v1948_v53  ;;  %v3088_v43 = vpop.f32.mrf.mxu0  ;;  %v1821_v53 = vadd.f32 %v1820_v12, %v1677_v37 }
 0x203   : > { %v3126_v32 = vpop.f32.mrf.mxu1 }
 0x204   : > { %v2147_v33 = vsub.f32 %v2131_v57, %v2139_v22  ;;  %v2130_v50 = vmul.f32 0.03125, %v2077_v48  ;;  %v2095_v7 = vadd.f32 %v3126_v32, %v1966_v52  ;;  %v1829_v22 = vadd.f32 %v4469_v49, %v1684_v46  ;;  %v1983_v56 = vpop.f32.mrf.mxu0 }
 0x205   : > { %v2088_v61 = vpop.f32.mrf.mxu1  ;;  %v1984_v49 = vadd.f32 %v1983_v56, %v1821_v53  ;;  %v2144_v52 = vmul.f32 %v2128_v8, %v2128_v8 }
 0x206   : > { %v2155_v18 = vadd.f32 1e-05, %v2147_v33  ;;  %v2146_v60 = vsub.f32 %v2130_v50, %v2138_v26  ;;  %v2133_v3 = vmul.f32 0.03125, %v2095_v7  ;;  %v2089_v4 = vadd.f32 %v2088_v61, %v1960_v63  ;;  %v3212_v50 = vld [vmem:[%s3497_s23 + $0x18] sm:$0xff] }
 0x207   : > { %v3129_v28 = vpop.f32.mrf.mxu1  ;;  %v1990_v54 = vadd.f32 %v3088_v43, %v1829_v22  ;;  %v3216_v22 = vld [vmem:[%s3497_s23 + $0x38] sm:$0xff] }
 0x208   : > { %3194 = vrsqrt.f32 %v2155_v18  ;;  %v2154_v34 = vadd.f32 1e-05, %v2146_v60  ;;  %v2149_v39 = vsub.f32 %v2133_v3, %v2141_v2  ;;  %v2132_v45 = vmul.f32 0.03125, %v2089_v4  ;;  %v3215_v18 = vld [vmem:[%s3497_s23 + $0x20] sm:$0xff] }
 0x209   : > { %v2107_v47 = vadd.f32 %v3129_v28, %v1978_v16  ;;  %v2100_v23 = vpop.f32.mrf.mxu1 }
 0x20a   : > { %3196 = vrsqrt.f32 %v2154_v34  ;;  %v2157_v26 = vadd.f32 1e-05, %v2149_v39  ;;  %v2148_v55 = vsub.f32 %v2132_v45, %v2140_v5  ;;  %v2101_v6 = vadd.f32 %v2100_v23, %v1972_v21  ;;  %v3217_v34 = vld [vmem:[%s3497_s23 + $0x30] sm:$0xff] }
 0x20b   : > { %v2135_v9 = vmul.f32 0.03125, %v2107_v47  ;;  %v3132_v58 = vpop.f32.mrf.mxu1 }
 0x20c   : > { %3198 = vrsqrt.f32 %v2157_v26  ;;  %v2156_v13 = vadd.f32 1e-05, %v2148_v55  ;;  %v2134_v11 = vmul.f32 0.03125, %v2101_v6  ;;  %v2119_v2 = vadd.f32 %v3132_v58, %v1990_v54 }
 0x20d   : > { %v2151_v10 = vsub.f32 %v2135_v9, %v4482_v24  ;;  %v2112_v12 = vpop.f32.mrf.mxu1 }
 0x20e   : > { %3200 = vrsqrt.f32 %v2156_v13  ;;  %v2150_v42 = vsub.f32 %v2134_v11, %v2142_v31  ;;  %v2137_v40 = vmul.f32 0.03125, %v2119_v2  ;;  %v2113_v41 = vadd.f32 %v2112_v12, %v1984_v49 }
 0x20f   : > { %v2159_v5 = vadd.f32 1e-05, %v2151_v10 }
 0x210   : > { %v2158_v1 = vadd.f32 1e-05, %v2150_v42  ;;  %v2153_v57 = vsub.f32 %v2137_v40, %v2145_v27  ;;  %v2136_v48 = vmul.f32 0.03125, %v2113_v41 }
 0x211   : > { %3202 = vrsqrt.f32 %v2159_v5 }
 0x212   : > { %3204 = vrsqrt.f32 %v2158_v1  ;;  %v2161_v51 = vadd.f32 1e-05, %v2153_v57  ;;  %v2152_v59 = vsub.f32 %v2136_v48, %v2144_v52 }
 0x214   : > { %3206 = vrsqrt.f32 %v2161_v51  ;;  %v2160_v24 = vadd.f32 1e-05, %v2152_v59 }
 0x215   : > { %v3195_v29 = vpop.eup %3194 }
 0x216   : > { %v2172_v44 = vmul.f32 %v3210_v25, %v3195_v29  ;;  %3208 = vrsqrt.f32 %v2160_v24 }
 0x217   : > { %v3197_v19 = vpop.eup %3196 }
 0x218   : > { %v2186_v14 = vmul.f32 %v2309_v20, %v2172_v44  ;;  %v2171_v32 = vmul.f32 %v3211_v38, %v3197_v19 }
 0x219   : > { %v3199_v63 = vpop.eup %3198 }
 0x21a   : > { %2194 = vst [vmem:[%s4512_s28 + $0x8] sm:$0xff] %v2186_v14  ;;  %v2185_v33 = vmul.f32 %v2309_v20, %v2171_v32  ;;  %v2174_v43 = vmul.f32 %v3212_v50, %v3199_v63 }
 0x21b   : > { %v3201_v7 = vpop.eup %3200 }
 0x21c   : > { %2193 = vst [vmem:[%s4512_s28] sm:$0xff] %v2185_v33  ;;  %v2188_v15 = vmul.f32 %v2309_v20, %v2174_v43  ;;  %v2173_v36 = vmul.f32 %v3213_v0, %v3201_v7 }
 0x21e   : > { %v3203_v35 = vpop.eup %3202  ;;  %2196 = vst [vmem:[%s4512_s28 + $0x18] sm:$0xff] %v2188_v15  ;;  %v2187_v46 = vmul.f32 %v2309_v20, %v2173_v36 }
 0x21f   : > { %v3205_v17 = vpop.eup %3204  ;;  %v2176_v61 = vmul.f32 %v3214_v30, %v3203_v35 }
 0x220   : > { %2195 = vst [vmem:[%s4512_s28 + $0x10] sm:$0xff] %v2187_v46  ;;  %v2175_v60 = vmul.f32 %v3215_v18, %v3205_v17 }
 0x221   : > { %v3207_v3 = vpop.eup %3206  ;;  %v2190_v4 = vmul.f32 %v2309_v20, %v2176_v61 }
 0x222   : > { %v2189_v37 = vmul.f32 %v2309_v20, %v2175_v60  ;;  %v2178_v16 = vmul.f32 %v3216_v22, %v3207_v3 }
 0x223   : > { %v3209_v21 = vpop.eup %3208  ;;  %2198 = vst [vmem:[%s4512_s28 + $0x28] sm:$0xff] %v2190_v4 }
 0x224   : > { %2197 = vst [vmem:[%s4512_s28 + $0x20] sm:$0xff] %v2189_v37  ;;  %v2192_v28 = vmul.f32 %v2309_v20, %v2178_v16  ;;  %v2177_v39 = vmul.f32 %v3217_v34, %v3209_v21 }
 0x226   : > { %2200 = vst [vmem:[%s4512_s28 + $0x38] sm:$0xff] %v2192_v28  ;;  %v2191_v56 = vmul.f32 %v2309_v20, %v2177_v39 }
 0x228   : > { %2199 = vst [vmem:[%s4512_s28 + $0x30] sm:$0xff] %v2191_v56 }
 0x229   : > { %3285 = shalt.err (!%p3282_p0)
}
 0x22a   : > { %s3286_s11 = scalar_lea.hbm %s4531_s4, 1024  ;;  %s3290_s30 = scalar_lea.hbm %s4581_s3, 2048 }
 0x22b   : > { %p3287_p5 = scmp.ne.s32.totalorder %s4531_s4, %s3286_s11  ;;  %p3291_p4 = scmp.lt.s32.totalorder %s4531_s4, %s4581_s3 }
 0x22c   : > { %p3292_p6 = scmp.lt.s32.totalorder %s3290_s30, %s3286_s11 }
 0x22d   : > { %p3288_p2 = pnand %p3287_p5, %p4780_p11 }
 0x22e   : > { %p3293_p8 = por %p3292_p6, %p3291_p4 }
 0x22f   : > { %p3289_p1 = pneg %p3288_p2 }
 0x231   : > { %p3294_p3 = pnand %p3293_p8, %p3289_p1 }
 0x233   : > { %3297 = shalt.err (!%p3294_p3)
}
 0x234   : > { %s3347_s20 = smov 128   ;;  %s3348_s28 = smov 8  }
 0x235   : > { %3139 = dma.vmem_to_hbm [thread:$0]  (%p4780_p11), %s4533_s17, 1024, %s4531_s4, %s2202_s16, %s3347_s20, %s3347_s20, %s3348_s28  }
 0x236 PF: > { %s2230_s29 = sand.u32 1, %s3328_s12   ;;  %p4781_p7 = scmp.ne.s32.totalorder %s4650_s19, 0 }
 0x237   : > { %p4782_p9 = scmp.ge.s32.totalorder %s3340_s15, 2  ;;  %s2231_s22 = scalar_lea.sflag [#allocation4], %s2230_s29 }
 0x239   : > { %p3150_p10 = pnand %p4782_p9, %p4781_p7 }
 0x23b   : > { %p3151_p12 = pneg %p3150_p10 }
 0x23d   : > { %3323 = dma.done.wait (%p3151_p12), %s2231_s22, 1024  }
 0x23e   : > { %3325 = vsyncadd (%p3151_p12), %s2231_s22, 4294966272  ;;  %p17_p13 = scmp.ge.s32.totalorder %s3423_s24, 4   ;;  %s4783_s12 = smov %s3332_s13 }
 0x23f   : > { %s4784_s13 = smov %s3336_s14  ;;  %s4785_s14 = smov %s3443_s5 }
 0x240   : > { %s4786_s15 = smov %s3423_s24  ;;  %19 = sbr.rel (!%p17_p13) target bundleno = 6 (0x6), region = 81 }
 0x245   :  { %2236 = vsyncpa [#allocation3], 1 }
 0x246   :  { %2238 = vsyncpa [#allocation3 + $0x1], 1 }
 0x247   :  { %2239 = vsyncpa [#allocation6], 1 }
 0x248   :  { %2240 = vsyncpa [#allocation4], 1 }
 0x249   :  { %2242 = vsyncpa [#allocation4 + $0x1], 1 }

</bundles_post_ra>
